<compile_context>
chip_gen: v7x
topology: tpu7x:2x2x1
jax: 0.10.0
libtpu: 0.0.40
codegen_flags: <defaults>
</compile_context>

<pallas_src>
import jax
import jax.numpy as jnp
from jax import lax
from jax.experimental import pallas as pl
from jax.experimental.pallas import tpu as pltpu

# ----------------------------- small config ---------------------------------
BATCH = 2            # batch size
NUM_ALIGN = 8        # num_alignments (conv W)
SEQ_IN = 6           # raw sequence length before the two pad tokens
SEQ = SEQ_IN + 2     # padded sequence length (conv N)
DIM = 32             # embedding dim (stand-in for 768)
MAX_NUM_GENES = 13   # module forces odd; gene vocab = 13 + 2 = 15
ORI_VOCAB = 3 + 2                        # 5
GENE_VOCAB = MAX_NUM_GENES + 2           # 15
ORIG_BP_LEN = 10
POS_TABLE = ORIG_BP_LEN + 2 + 1          # LearnedPositionalEmbedding table
CONV_IN = ORI_VOCAB + GENE_VOCAB         # 20 == nn.Conv2d in_channels
LIN_IN = BATCH * NUM_ALIGN               # flattened conv output per "N"

M = NUM_ALIGN * BATCH * SEQ              # 128 tokens per stream (rows)
GRP = BATCH * SEQ                        # 16 rows per alignment slice
NTAP = 9                                 # 3x3 conv taps

# Combined one-hot lane layout for the block-diagonal gather matmul.
OFF_ORI_TOK = 0
OFF_ORI_POS = OFF_ORI_TOK + ORI_VOCAB          # 5
OFF_GENE_TOK = OFF_ORI_POS + POS_TABLE         # 18
OFF_GENE_POS = OFF_GENE_TOK + GENE_VOCAB       # 33
ONES_LANE = OFF_GENE_POS + POS_TABLE           # 46 (constant hot lane -> bias)
OH_W = 48                                      # one-hot width, padded to 8x
XW = 2 * DIM + 1                               # 65: [ori-x | gene-x | 1]

# Conv tap -> row shift (dm) groups; taps sharing a shift share one roll.
_tap_by_dm = {}
for _kh in range(3):
  for _kw in range(3):
    _dm = (_kw - 1) * GRP + (_kh - 1) * SEQ
    _tap_by_dm.setdefault(_dm, []).append(_kh * 3 + _kw)
_TAP_BY_DM = tuple(sorted((dm, tuple(t)) for dm, t in _tap_by_dm.items()))

_VMEM = pl.BlockSpec(memory_space=pltpu.MemorySpace.VMEM)
_SMEM = pl.BlockSpec(memory_space=pltpu.MemorySpace.SMEM)


# ------------------------------ fused kernel ---------------------------------
def _fused_forward_kernel(ids_ref, w1_ref, w2_ref, wconv_ref, vw9_ref,
                          scal_ref, out_ref):
  f32 = jnp.float32
  ids = ids_ref[...]                                             # [M, 4]

  # Combined tok/pos one-hot for both streams (lane offsets pre-baked into
  # the ids) plus a constant ones-lane that carries the folded biases.
  lanes = lax.broadcasted_iota(jnp.int32, (M, OH_W), 1)
  onehot = ((lanes == ids[:, 0:1]) | (lanes == ids[:, 1:2]) |
            (lanes == ids[:, 2:3]) | (lanes == ids[:, 3:4]) |
            (lanes == ONES_LANE)).astype(f32)                    # [M, 48]

  # Two wide block-diagonal MXU matmuls: embedding gather + positional add
  # for both streams, then both per-stream vocab heads (bias via ones-lane).
  # TODO(synk): MSATransformer stack is an external dependency; it is
  # replaced by this linear readout to the vocabulary.
  x = jnp.dot(onehot, w1_ref[...], preferred_element_type=f32)   # [M, 65]
  logits = jnp.dot(x, w2_ref[...], preferred_element_type=f32)   # [M, 20]

  # DivideMax over the alignment axis r: rows are (r,b,l)-ordered, so each r
  # is one contiguous GRP-row slice; depth-3 max tree + one reciprocal on the
  # [GRP,20] max instead of 16 per-slice divides/stores.
  s = [logits[r * GRP:(r + 1) * GRP, :] for r in range(NUM_ALIGN)]
  dmax = jnp.maximum(
      jnp.maximum(jnp.maximum(s[0], s[1]), jnp.maximum(s[2], s[3])),
      jnp.maximum(jnp.maximum(s[4], s[5]), jnp.maximum(s[6], s[7])))
  inv = pl.reciprocal(dmax)                                      # exact
  norm = logits * jnp.concatenate([inv] * NUM_ALIGN, axis=0)     # [M, 20]

  # 3x3 conv over (H=batch, W=alignment): one MXU channel contraction gives
  # per-tap partials P[m, tap]; each tap is then a sublane roll of P (every
  # shift is a multiple of 8).  Wrapped rows are killed later by vw9 == 0.
  P = jnp.dot(norm, wconv_ref[...], preferred_element_type=f32)  # [M, 9]
  lane9 = lax.broadcasted_iota(jnp.int32, (M, NTAP), 1)
  acc9 = jnp.zeros((M, NTAP), f32)
  for dm, taps in _TAP_BY_DM:
    src = P if dm == 0 else pltpu.roll(P, shift=(-dm) % M, axis=0)
    mask = lane9 == taps[0]
    for t in taps[1:]:
      mask = mask | (lane9 == t)
    acc9 = acc9 + jnp.where(mask, src, 0.0)

  # Final linear: per-row (validity * lin_w) folded into vw9; depth-4 tree
  # sum over the 16 (r,b) row groups; one 9-lane reduce; conv_b folded into
  # the effective bias (scal_ref[0]) in the glue.
  w_acc = acc9 * vw9_ref[...]                                    # [M, 9]
  parts = [w_acc[k * SEQ:(k + 1) * SEQ, :] for k in range(LIN_IN)]
  while len(parts) > 1:
    parts = [parts[i] + parts[i + 1] for i in range(0, len(parts), 2)]
  lin = jnp.sum(parts[0], axis=1, keepdims=True) + scal_ref[0]   # [SEQ, 1]

  # dropout = identity (eval) -> softmax(dim=1) -> * score.
  mx = jnp.max(lin, axis=1, keepdims=True)
  e = jnp.exp(lin - mx)
  probs = e / jnp.sum(e, axis=1, keepdims=True)
  out_ref[...] = probs * scal_ref[1]


# ------------------------------ JAX glue -------------------------------------
def _learned_positions(ids):
  """LearnedPositionalEmbedding positions (padding_idx=0, cumsum over dim=1)."""
  mask = (ids != 0).astype(jnp.int32)
  return jnp.cumsum(mask, axis=1) * mask


def _flatten_rbl(x):
  """[B, R, L] int -> [M, 1] int32 with row index m = r*GRP + b*SEQ + l."""
  return jnp.transpose(x, (1, 0, 2)).reshape(M, 1).astype(jnp.int32)


def init_params(key):
  ks = jax.random.split(key, 12)
  s = 0.02
  zero_row0 = lambda t: t.at[0].set(0.0)  # nn.Embedding padding_idx=0 row
  return dict(
      ori_emb=jax.random.normal(ks[0], (ORI_VOCAB, DIM), jnp.float32) * s,
      ori_pos=zero_row0(jax.random.normal(ks[1], (POS_TABLE, DIM), jnp.float32) * s),
      ori_out_w=jax.random.normal(ks[2], (DIM, ORI_VOCAB), jnp.float32) * s,
      ori_out_b=jax.random.normal(ks[3], (1, ORI_VOCAB), jnp.float32) * s,
      gene_emb=jax.random.normal(ks[4], (GENE_VOCAB, DIM), jnp.float32) * s,
      gene_pos=zero_row0(jax.random.normal(ks[5], (POS_TABLE, DIM), jnp.float32) * s),
      gene_out_w=jax.random.normal(ks[6], (DIM, GENE_VOCAB), jnp.float32) * s,
      gene_out_b=jax.random.normal(ks[7], (1, GENE_VOCAB), jnp.float32) * s,
      conv_w=jax.random.normal(ks[8], (1, CONV_IN, 3, 3), jnp.float32) * s,
      conv_b=jax.random.normal(ks[9], (1,), jnp.float32) * s,
      lin_w=jax.random.normal(ks[10], (LIN_IN, 1), jnp.float32) * s,
      lin_b=jax.random.normal(ks[11], (1, 1), jnp.float32) * s,
  )


def _pad_streams(msa):
  orientation = msa[:, 0]
  gene_id = msa[:, 1]
  orientation = jnp.pad(orientation, ((0, 0), (0, 0), (1, 0)), constant_values=3)
  orientation = jnp.pad(orientation, ((0, 0), (0, 0), (0, 1)), constant_values=4)
  gene_id = jnp.pad(gene_id, ((0, 0), (0, 0), (1, 0)),
                    constant_values=MAX_NUM_GENES)
  gene_id = jnp.pad(gene_id, ((0, 0), (0, 0), (0, 1)),
                    constant_values=MAX_NUM_GENES + 1)
  return orientation, gene_id


def operon_transformer_classifier_forward(params, msa, score):
  """msa: int32 [B, 4, R, SEQ_IN]; score: f32 [1]."""
  orientation, gene_id = _pad_streams(msa)
  ori_pos = _learned_positions(orientation)
  gene_pos = _learned_positions(gene_id)

  # Four id streams packed into one [M, 4] input with lane offsets baked in.
  ids4 = jnp.concatenate(
      [_flatten_rbl(orientation) + OFF_ORI_TOK,
       _flatten_rbl(ori_pos) + OFF_ORI_POS,
       _flatten_rbl(gene_id) + OFF_GENE_TOK,
       _flatten_rbl(gene_pos) + OFF_GENE_POS], axis=1)

  # Stacked embedding/positional tables: [48, 65].  Ori stream -> x lanes
  # 0..31, gene stream -> lanes 32..63, ones-lane -> x lane 64.
  w1 = jnp.zeros((OH_W, XW), jnp.float32)
  w1 = w1.at[OFF_ORI_TOK:OFF_ORI_TOK + ORI_VOCAB, 0:DIM].set(params["ori_emb"])
  w1 = w1.at[OFF_ORI_POS:OFF_ORI_POS + POS_TABLE, 0:DIM].set(params["ori_pos"])
  w1 = w1.at[OFF_GENE_TOK:OFF_GENE_TOK + GENE_VOCAB, DIM:2 * DIM].set(params["gene_emb"])
  w1 = w1.at[OFF_GENE_POS:OFF_GENE_POS + POS_TABLE, DIM:2 * DIM].set(params["gene_pos"])
  w1 = w1.at[ONES_LANE, 2 * DIM].set(1.0)

  # Block-diagonal vocab heads with both biases folded into the last row.
  w2 = jnp.zeros((XW, CONV_IN), jnp.float32)
  w2 = w2.at[0:DIM, 0:ORI_VOCAB].set(params["ori_out_w"])
  w2 = w2.at[DIM:2 * DIM, ORI_VOCAB:].set(params["gene_out_w"])
  w2 = w2.at[2 * DIM, 0:ORI_VOCAB].set(params["ori_out_b"][0])
  w2 = w2.at[2 * DIM, ORI_VOCAB:].set(params["gene_out_b"][0])

  # Conv weight reshaped for per-tap channel contraction: [C,3,3] -> [C,9].
  wconv = params["conv_w"][0].reshape(CONV_IN, NTAP)

  # Per-row, per-tap (boundary validity) x (final linear weight), precomputed.
  mrow = jnp.arange(M)
  b_idx = (mrow // SEQ) % BATCH
  r_idx = mrow // GRP
  valid = []
  for kh in range(3):
    for kw in range(3):
      db, dr = kh - 1, kw - 1
      valid.append((b_idx + db >= 0) & (b_idx + db < BATCH) &
                   (r_idx + dr >= 0) & (r_idx + dr < NUM_ALIGN))
  valid9 = jnp.stack(valid, axis=1).astype(jnp.float32)           # [M, 9]
  w_q = params["lin_w"].reshape(BATCH, NUM_ALIGN)                 # [b, r]
  w_perm = jnp.broadcast_to(jnp.transpose(w_q)[:, :, None],
                            (NUM_ALIGN, BATCH, SEQ)).reshape(M, 1)
  vw9 = valid9 * w_perm                                           # [M, 9]

  # Conv bias folded into the linear bias: lin(x + cb) = lin(x) + cb*sum(w).
  lin_b_eff = params["lin_b"][0, 0] + params["conv_b"][0] * jnp.sum(params["lin_w"])
  scalars = jnp.stack([lin_b_eff, score[0]]).astype(jnp.float32)  # (2,) SMEM

  return pl.pallas_call(
      _fused_forward_kernel,
      out_shape=jax.ShapeDtypeStruct((SEQ, 1), jnp.float32),
      in_specs=[_VMEM, _VMEM, _VMEM, _VMEM, _VMEM, _SMEM],
      out_specs=_VMEM,
  )(ids4, w1, w2, wconv, vw9, scalars)


def _reference_forward(params, msa, score):
  """Plain-JAX mirror of the forward (same MSATransformer stand-in)."""
  def stream(ids, emb, pose, w, b):
    tok = jnp.take(emb, ids, axis=0)
    pos = jnp.take(pose, _learned_positions(ids), axis=0)
    logits = (tok + pos) @ w + b                              # [B,R,L,V]
    return jnp.transpose(logits, (2, 3, 0, 1))                # [L,V,B,R]

  orientation, gene_id = _pad_streams(msa)
  ori_l = stream(orientation, params["ori_emb"], params["ori_pos"],
                 params["ori_out_w"], params["ori_out_b"])
  gene_l = stream(gene_id, params["gene_emb"], params["gene_pos"],
                  params["gene_out_w"], params["gene_out_b"])
  ori_l = ori_l / jnp.max(ori_l, axis=-1, keepdims=True)
  gene_l = gene_l / jnp.max(gene_l, axis=-1, keepdims=True)
  feats = jnp.concatenate([ori_l, gene_l], axis=1)            # [L,20,B,R]
  conv = lax.conv_general_dilated(
      feats, params["conv_w"], (1, 1), "SAME",
      dimension_numbers=("NCHW", "OIHW", "NCHW"))
  conv = conv + params["conv_b"].reshape(1, 1, 1, 1)
  flat = conv.reshape(SEQ, -1)
  lin = flat @ params["lin_w"] + params["lin_b"]
  return jax.nn.softmax(lin, axis=1) * score.reshape(1, 1)


# ------------------------------ main ------------------------------------------
if __name__ == "__main__":
  key = jax.random.PRNGKey(0)
  k_msa, k_gene, k_score = jax.random.split(key, 3)

  orientation_ids = jax.random.randint(
      k_msa, (BATCH, NUM_ALIGN, SEQ_IN), 0, 3, dtype=jnp.int32)
  gene_ids = jax.random.randint(
      k_gene, (BATCH, NUM_ALIGN, SEQ_IN), 0, MAX_NUM_GENES, dtype=jnp.int32)
  filler = jnp.zeros((BATCH, NUM_ALIGN, SEQ_IN), jnp.int32)
  msa = jnp.stack([orientation_ids, gene_ids, filler, filler], axis=1)
  score = jax.random.uniform(k_score, (1,), jnp.float32) + 0.5

  params = init_params(jax.random.PRNGKey(42))

  fwd = jax.jit(operon_transformer_classifier_forward)
  out = jax.block_until_ready(fwd(params, msa, score))
  ref = jax.block_until_ready(_reference_forward(params, msa, score))

  assert out.shape == (SEQ, 1)
  assert bool(jnp.all(jnp.isfinite(out)))
  assert bool(jnp.allclose(out, ref, rtol=1e-4, atol=1e-5))
  print("KERNEL_OK")
</pallas_src>

<mosaic_0001>
module attributes {stable_mosaic.version = 11 : i64} {
  func.func @_fused_forward_kernel(%arg0: memref<128x4xi32, #tpu.memory_space<vmem>>, %arg1: memref<48x65xf32, #tpu.memory_space<vmem>>, %arg2: memref<65x20xf32, #tpu.memory_space<vmem>>, %arg3: memref<20x9xf32, #tpu.memory_space<vmem>>, %arg4: memref<128x9xf32, #tpu.memory_space<vmem>>, %arg5: memref<2xf32, #tpu.memory_space<smem>>, %arg6: memref<8x1xf32, #tpu.memory_space<vmem>>) attributes {dimension_semantics = [], scalar_prefetch = 0 : i64, scratch_operands = 0 : i64, tpu.core_type = #tpu.core_type<tc>} {
    %c0 = arith.constant 0 : index
    %c0_0 = arith.constant 0 : index
    %0 = vector.load %arg0[%c0, %c0_0] : memref<128x4xi32, #tpu.memory_space<vmem>>, vector<128x4xi32>
    %1 = tpu.iota {dimensions = array<i32: 1>} : vector<128x48xi32>
    %2 = vector.extract_strided_slice %0 {offsets = [0, 0], sizes = [128, 1], strides = [1, 1]} : vector<128x4xi32> to vector<128x1xi32>
    %3 = vector.broadcast %2 : vector<128x1xi32> to vector<128x48xi32>
    %4 = arith.cmpi eq, %1, %3 : vector<128x48xi32>
    %5 = vector.extract_strided_slice %0 {offsets = [0, 1], sizes = [128, 1], strides = [1, 1]} : vector<128x4xi32> to vector<128x1xi32>
    %6 = vector.broadcast %5 : vector<128x1xi32> to vector<128x48xi32>
    %7 = arith.cmpi eq, %1, %6 : vector<128x48xi32>
    %8 = arith.ori %4, %7 : vector<128x48xi1>
    %9 = vector.extract_strided_slice %0 {offsets = [0, 2], sizes = [128, 1], strides = [1, 1]} : vector<128x4xi32> to vector<128x1xi32>
    %10 = vector.broadcast %9 : vector<128x1xi32> to vector<128x48xi32>
    %11 = arith.cmpi eq, %1, %10 : vector<128x48xi32>
    %12 = arith.ori %8, %11 : vector<128x48xi1>
    %13 = vector.extract_strided_slice %0 {offsets = [0, 3], sizes = [128, 1], strides = [1, 1]} : vector<128x4xi32> to vector<128x1xi32>
    %14 = vector.broadcast %13 : vector<128x1xi32> to vector<128x48xi32>
    %15 = arith.cmpi eq, %1, %14 : vector<128x48xi32>
    %16 = arith.ori %12, %15 : vector<128x48xi1>
    %c46_i32 = arith.constant 46 : i32
    %17 = vector.broadcast %c46_i32 : i32 to vector<128x48xi32>
    %18 = arith.cmpi eq, %1, %17 : vector<128x48xi32>
    %19 = arith.ori %16, %18 : vector<128x48xi1>
    %20 = arith.extui %19 : vector<128x48xi1> to vector<128x48xi32>
    %21 = arith.sitofp %20 : vector<128x48xi32> to vector<128x48xf32>
    %c0_1 = arith.constant 0 : index
    %c0_2 = arith.constant 0 : index
    %22 = vector.load %arg1[%c0_1, %c0_2] : memref<48x65xf32, #tpu.memory_space<vmem>>, vector<48x65xf32>
    %cst = arith.constant dense<0.000000e+00> : vector<128x65xf32>
    %23 = tpu.matmul %21, %22, %cst {dimension_numbers = #tpu.dot_dimension_numbers<[1], [0], [0], [1], [0, 0, 1, 1], [], []>} : vector<128x48xf32>, vector<48x65xf32>, vector<128x65xf32> -> vector<128x65xf32>
    %c0_3 = arith.constant 0 : index
    %c0_4 = arith.constant 0 : index
    %24 = vector.load %arg2[%c0_3, %c0_4] : memref<65x20xf32, #tpu.memory_space<vmem>>, vector<65x20xf32>
    %cst_5 = arith.constant dense<0.000000e+00> : vector<128x20xf32>
    %25 = tpu.matmul %23, %24, %cst_5 {dimension_numbers = #tpu.dot_dimension_numbers<[1], [0], [0], [1], [0, 0, 1, 1], [], []>} : vector<128x65xf32>, vector<65x20xf32>, vector<128x20xf32> -> vector<128x20xf32>
    %26 = vector.extract_strided_slice %25 {offsets = [0, 0], sizes = [16, 20], strides = [1, 1]} : vector<128x20xf32> to vector<16x20xf32>
    %27 = vector.extract_strided_slice %25 {offsets = [16, 0], sizes = [16, 20], strides = [1, 1]} : vector<128x20xf32> to vector<16x20xf32>
    %28 = vector.extract_strided_slice %25 {offsets = [32, 0], sizes = [16, 20], strides = [1, 1]} : vector<128x20xf32> to vector<16x20xf32>
    %29 = vector.extract_strided_slice %25 {offsets = [48, 0], sizes = [16, 20], strides = [1, 1]} : vector<128x20xf32> to vector<16x20xf32>
    %30 = vector.extract_strided_slice %25 {offsets = [64, 0], sizes = [16, 20], strides = [1, 1]} : vector<128x20xf32> to vector<16x20xf32>
    %31 = vector.extract_strided_slice %25 {offsets = [80, 0], sizes = [16, 20], strides = [1, 1]} : vector<128x20xf32> to vector<16x20xf32>
    %32 = vector.extract_strided_slice %25 {offsets = [96, 0], sizes = [16, 20], strides = [1, 1]} : vector<128x20xf32> to vector<16x20xf32>
    %33 = vector.extract_strided_slice %25 {offsets = [112, 0], sizes = [16, 20], strides = [1, 1]} : vector<128x20xf32> to vector<16x20xf32>
    %34 = arith.maximumf %26, %27 : vector<16x20xf32>
    %35 = arith.maximumf %28, %29 : vector<16x20xf32>
    %36 = arith.maximumf %34, %35 : vector<16x20xf32>
    %37 = arith.maximumf %30, %31 : vector<16x20xf32>
    %38 = arith.maximumf %32, %33 : vector<16x20xf32>
    %39 = arith.maximumf %37, %38 : vector<16x20xf32>
    %40 = arith.maximumf %36, %39 : vector<16x20xf32>
    %41 = tpu.reciprocal %40 : vector<16x20xf32> -> vector<16x20xf32>
    %42 = tpu.concatenate %41, %41, %41, %41, %41, %41, %41, %41 in 0 : vector<16x20xf32>, vector<16x20xf32>, vector<16x20xf32>, vector<16x20xf32>, vector<16x20xf32>, vector<16x20xf32>, vector<16x20xf32>, vector<16x20xf32> -> vector<128x20xf32>
    %43 = arith.mulf %25, %42 : vector<128x20xf32>
    %c0_6 = arith.constant 0 : index
    %c0_7 = arith.constant 0 : index
    %44 = vector.load %arg3[%c0_6, %c0_7] : memref<20x9xf32, #tpu.memory_space<vmem>>, vector<20x9xf32>
    %cst_8 = arith.constant dense<0.000000e+00> : vector<128x9xf32>
    %45 = tpu.matmul %43, %44, %cst_8 {dimension_numbers = #tpu.dot_dimension_numbers<[1], [0], [0], [1], [0, 0, 1, 1], [], []>} : vector<128x20xf32>, vector<20x9xf32>, vector<128x9xf32> -> vector<128x9xf32>
    %46 = tpu.iota {dimensions = array<i32: 1>} : vector<128x9xi32>
    %cst_9 = arith.constant 0.000000e+00 : f32
    %47 = vector.broadcast %cst_9 : f32 to vector<128x9xf32>
    %c24_i32 = arith.constant 24 : i32
    %48 = tpu.dynamic_rotate %45 by %c24_i32 dim 0 : vector<128x9xf32>, i32 -> vector<128x9xf32>
    %c0_i32 = arith.constant 0 : i32
    %49 = vector.broadcast %c0_i32 : i32 to vector<128x9xi32>
    %50 = arith.cmpi eq, %46, %49 : vector<128x9xi32>
    %cst_10 = arith.constant 0.000000e+00 : f32
    %51 = vector.broadcast %cst_10 : f32 to vector<128x9xf32>
    %52 = arith.select %50, %48, %51 : vector<128x9xi1>, vector<128x9xf32>
    %53 = arith.addf %47, %52 : vector<128x9xf32>
    %c16_i32 = arith.constant 16 : i32
    %54 = tpu.dynamic_rotate %45 by %c16_i32 dim 0 : vector<128x9xf32>, i32 -> vector<128x9xf32>
    %c3_i32 = arith.constant 3 : i32
    %55 = vector.broadcast %c3_i32 : i32 to vector<128x9xi32>
    %56 = arith.cmpi eq, %46, %55 : vector<128x9xi32>
    %cst_11 = arith.constant 0.000000e+00 : f32
    %57 = vector.broadcast %cst_11 : f32 to vector<128x9xf32>
    %58 = arith.select %56, %54, %57 : vector<128x9xi1>, vector<128x9xf32>
    %59 = arith.addf %53, %58 : vector<128x9xf32>
    %c8_i32 = arith.constant 8 : i32
    %60 = tpu.dynamic_rotate %45 by %c8_i32 dim 0 : vector<128x9xf32>, i32 -> vector<128x9xf32>
    %c1_i32 = arith.constant 1 : i32
    %61 = vector.broadcast %c1_i32 : i32 to vector<128x9xi32>
    %62 = arith.cmpi eq, %46, %61 : vector<128x9xi32>
    %c6_i32 = arith.constant 6 : i32
    %63 = vector.broadcast %c6_i32 : i32 to vector<128x9xi32>
    %64 = arith.cmpi eq, %46, %63 : vector<128x9xi32>
    %65 = arith.ori %62, %64 : vector<128x9xi1>
    %cst_12 = arith.constant 0.000000e+00 : f32
    %66 = vector.broadcast %cst_12 : f32 to vector<128x9xf32>
    %67 = arith.select %65, %60, %66 : vector<128x9xi1>, vector<128x9xf32>
    %68 = arith.addf %59, %67 : vector<128x9xf32>
    %c4_i32 = arith.constant 4 : i32
    %69 = vector.broadcast %c4_i32 : i32 to vector<128x9xi32>
    %70 = arith.cmpi eq, %46, %69 : vector<128x9xi32>
    %cst_13 = arith.constant 0.000000e+00 : f32
    %71 = vector.broadcast %cst_13 : f32 to vector<128x9xf32>
    %72 = arith.select %70, %45, %71 : vector<128x9xi1>, vector<128x9xf32>
    %73 = arith.addf %68, %72 : vector<128x9xf32>
    %c120_i32 = arith.constant 120 : i32
    %74 = tpu.dynamic_rotate %45 by %c120_i32 dim 0 : vector<128x9xf32>, i32 -> vector<128x9xf32>
    %c2_i32 = arith.constant 2 : i32
    %75 = vector.broadcast %c2_i32 : i32 to vector<128x9xi32>
    %76 = arith.cmpi eq, %46, %75 : vector<128x9xi32>
    %c7_i32 = arith.constant 7 : i32
    %77 = vector.broadcast %c7_i32 : i32 to vector<128x9xi32>
    %78 = arith.cmpi eq, %46, %77 : vector<128x9xi32>
    %79 = arith.ori %76, %78 : vector<128x9xi1>
    %cst_14 = arith.constant 0.000000e+00 : f32
    %80 = vector.broadcast %cst_14 : f32 to vector<128x9xf32>
    %81 = arith.select %79, %74, %80 : vector<128x9xi1>, vector<128x9xf32>
    %82 = arith.addf %73, %81 : vector<128x9xf32>
    %c112_i32 = arith.constant 112 : i32
    %83 = tpu.dynamic_rotate %45 by %c112_i32 dim 0 : vector<128x9xf32>, i32 -> vector<128x9xf32>
    %c5_i32 = arith.constant 5 : i32
    %84 = vector.broadcast %c5_i32 : i32 to vector<128x9xi32>
    %85 = arith.cmpi eq, %46, %84 : vector<128x9xi32>
    %cst_15 = arith.constant 0.000000e+00 : f32
    %86 = vector.broadcast %cst_15 : f32 to vector<128x9xf32>
    %87 = arith.select %85, %83, %86 : vector<128x9xi1>, vector<128x9xf32>
    %88 = arith.addf %82, %87 : vector<128x9xf32>
    %c104_i32 = arith.constant 104 : i32
    %89 = tpu.dynamic_rotate %45 by %c104_i32 dim 0 : vector<128x9xf32>, i32 -> vector<128x9xf32>
    %c8_i32_16 = arith.constant 8 : i32
    %90 = vector.broadcast %c8_i32_16 : i32 to vector<128x9xi32>
    %91 = arith.cmpi eq, %46, %90 : vector<128x9xi32>
    %cst_17 = arith.constant 0.000000e+00 : f32
    %92 = vector.broadcast %cst_17 : f32 to vector<128x9xf32>
    %93 = arith.select %91, %89, %92 : vector<128x9xi1>, vector<128x9xf32>
    %94 = arith.addf %88, %93 : vector<128x9xf32>
    %c0_18 = arith.constant 0 : index
    %c0_19 = arith.constant 0 : index
    %95 = vector.load %arg4[%c0_18, %c0_19] : memref<128x9xf32, #tpu.memory_space<vmem>>, vector<128x9xf32>
    %96 = arith.mulf %94, %95 : vector<128x9xf32>
    %97 = vector.extract_strided_slice %96 {offsets = [0, 0], sizes = [8, 9], strides = [1, 1]} : vector<128x9xf32> to vector<8x9xf32>
    %98 = vector.extract_strided_slice %96 {offsets = [8, 0], sizes = [8, 9], strides = [1, 1]} : vector<128x9xf32> to vector<8x9xf32>
    %99 = vector.extract_strided_slice %96 {offsets = [16, 0], sizes = [8, 9], strides = [1, 1]} : vector<128x9xf32> to vector<8x9xf32>
    %100 = vector.extract_strided_slice %96 {offsets = [24, 0], sizes = [8, 9], strides = [1, 1]} : vector<128x9xf32> to vector<8x9xf32>
    %101 = vector.extract_strided_slice %96 {offsets = [32, 0], sizes = [8, 9], strides = [1, 1]} : vector<128x9xf32> to vector<8x9xf32>
    %102 = vector.extract_strided_slice %96 {offsets = [40, 0], sizes = [8, 9], strides = [1, 1]} : vector<128x9xf32> to vector<8x9xf32>
    %103 = vector.extract_strided_slice %96 {offsets = [48, 0], sizes = [8, 9], strides = [1, 1]} : vector<128x9xf32> to vector<8x9xf32>
    %104 = vector.extract_strided_slice %96 {offsets = [56, 0], sizes = [8, 9], strides = [1, 1]} : vector<128x9xf32> to vector<8x9xf32>
    %105 = vector.extract_strided_slice %96 {offsets = [64, 0], sizes = [8, 9], strides = [1, 1]} : vector<128x9xf32> to vector<8x9xf32>
    %106 = vector.extract_strided_slice %96 {offsets = [72, 0], sizes = [8, 9], strides = [1, 1]} : vector<128x9xf32> to vector<8x9xf32>
    %107 = vector.extract_strided_slice %96 {offsets = [80, 0], sizes = [8, 9], strides = [1, 1]} : vector<128x9xf32> to vector<8x9xf32>
    %108 = vector.extract_strided_slice %96 {offsets = [88, 0], sizes = [8, 9], strides = [1, 1]} : vector<128x9xf32> to vector<8x9xf32>
    %109 = vector.extract_strided_slice %96 {offsets = [96, 0], sizes = [8, 9], strides = [1, 1]} : vector<128x9xf32> to vector<8x9xf32>
    %110 = vector.extract_strided_slice %96 {offsets = [104, 0], sizes = [8, 9], strides = [1, 1]} : vector<128x9xf32> to vector<8x9xf32>
    %111 = vector.extract_strided_slice %96 {offsets = [112, 0], sizes = [8, 9], strides = [1, 1]} : vector<128x9xf32> to vector<8x9xf32>
    %112 = vector.extract_strided_slice %96 {offsets = [120, 0], sizes = [8, 9], strides = [1, 1]} : vector<128x9xf32> to vector<8x9xf32>
    %113 = arith.addf %97, %98 : vector<8x9xf32>
    %114 = arith.addf %99, %100 : vector<8x9xf32>
    %115 = arith.addf %101, %102 : vector<8x9xf32>
    %116 = arith.addf %103, %104 : vector<8x9xf32>
    %117 = arith.addf %105, %106 : vector<8x9xf32>
    %118 = arith.addf %107, %108 : vector<8x9xf32>
    %119 = arith.addf %109, %110 : vector<8x9xf32>
    %120 = arith.addf %111, %112 : vector<8x9xf32>
    %121 = arith.addf %113, %114 : vector<8x9xf32>
    %122 = arith.addf %115, %116 : vector<8x9xf32>
    %123 = arith.addf %117, %118 : vector<8x9xf32>
    %124 = arith.addf %119, %120 : vector<8x9xf32>
    %125 = arith.addf %121, %122 : vector<8x9xf32>
    %126 = arith.addf %123, %124 : vector<8x9xf32>
    %127 = arith.addf %125, %126 : vector<8x9xf32>
    %cst_20 = arith.constant dense<0.000000e+00> : vector<8xf32>
    %128 = vector.multi_reduction <add>, %127, %cst_20 [1] : vector<8x9xf32> to vector<8xf32>
    %129 = vector.shape_cast %128 : vector<8xf32> to vector<8x1xf32>
    %c0_21 = arith.constant 0 : index
    %130 = memref.load %arg5[%c0_21] : memref<2xf32, #tpu.memory_space<smem>>
    %131 = vector.broadcast %130 : f32 to vector<8x1xf32>
    %132 = arith.addf %129, %131 : vector<8x1xf32>
    %cst_22 = arith.constant dense<0xFF800000> : vector<8xf32>
    %133 = vector.multi_reduction <maximumf>, %132, %cst_22 [1] : vector<8x1xf32> to vector<8xf32>
    %134 = vector.shape_cast %133 : vector<8xf32> to vector<8x1xf32>
    %135 = arith.subf %132, %134 : vector<8x1xf32>
    %136 = math.exp %135 : vector<8x1xf32>
    %cst_23 = arith.constant dense<0.000000e+00> : vector<8xf32>
    %137 = vector.multi_reduction <add>, %136, %cst_23 [1] : vector<8x1xf32> to vector<8xf32>
    %138 = vector.shape_cast %137 : vector<8xf32> to vector<8x1xf32>
    %139 = arith.divf %136, %138 : vector<8x1xf32>
    %c1 = arith.constant 1 : index
    %140 = memref.load %arg5[%c1] : memref<2xf32, #tpu.memory_space<smem>>
    %141 = vector.broadcast %140 : f32 to vector<8x1xf32>
    %142 = arith.mulf %139, %141 : vector<8x1xf32>
    %c0_24 = arith.constant 0 : index
    %c0_25 = arith.constant 0 : index
    %143 = vector.load %arg6[%c0_24, %c0_25] : memref<8x1xf32, #tpu.memory_space<vmem>>, vector<8x1xf32>
    tpu.vector_store %arg6[%c0_24, %c0_25], %142 {strides = array<i32>} : memref<8x1xf32, #tpu.memory_space<vmem>>, vector<8x1xf32>,
    return
  }
}

</mosaic_0001>

<bundles_post_ra>
// kernel: mul.10
= control target key start
LH: loop header
LB: loop body
LE: loop exit
PB: predicated region body
PF: predicated region fallthrough
CT: control target
= control target key end

     0   :  { %s168_s22 = smov 104   ;;  %vm41_vm0 = vcmask 64512   ;;  %s169_s23 = smov 112   ;;  %vm47_vm1 = vcmask 1048512   ;;  %vm53_vm2 = vcmask 982912   ;;  %vm59_vm3 = vcmask 917312   ;;  %s219_s0 = inlined_call_operand.vmem [shape: f32[8,2,8], index: 0, kind: input, shape index: {}]   ;;  %s220_s1 = inlined_call_operand.vmem [shape: f32[128], index: 1, kind: output, shape index: {}]  }
   0x1   :  { %v145_v0 = vld [vmem:[%s219_s0 + $0xe] sm:$0x3]  ;;  %v146_v1 = vld [vmem:[%s219_s0 + $0xc] sm:$0x3]  ;;  %v147_v2 = vld [vmem:[%s219_s0 + $0xa] sm:$0x3] }
   0x2   :  { %8 = vst [vmem:[#allocation1 + $0x38] sm:$0x3] %v145_v0  ;;  %13 = vst [vmem:[#allocation1 + $0x30] sm:$0x3] %v146_v1  ;;  %v148_v3 = vld [vmem:[%s219_s0 + $0x8] sm:$0x3] }
   0x3   :  { %18 = vst [vmem:[#allocation1 + $0x28] sm:$0x3] %v147_v2  ;;  %23 = vst [vmem:[#allocation1 + $0x20] sm:$0x3] %v148_v3  ;;  %v149_v4 = vld [vmem:[%s219_s0 + $0x6] sm:$0x3] }
   0x4   :  { %v150_v5 = vld [vmem:[%s219_s0 + $0x4] sm:$0x3]  ;;  %28 = vst [vmem:[#allocation1 + $0x18] sm:$0x3] %v149_v4  ;;  %v151_v6 = vld [vmem:[%s219_s0 + $0x2] sm:$0x3] }
   0x5   :  { %33 = vst [vmem:[#allocation1 + $0x10] sm:$0x3] %v150_v5  ;;  %v38_v7 = vld [vmem:[%s219_s0] sm:$0x3]  ;;  %37 = vst [vmem:[#allocation1 + $0x8] sm:$0x3] %v151_v6 }
   0x6   :  { %39 = vst [vmem:[#allocation1] sm:$0x3] %v38_v7  ;;  %s167_s0 = smov 120   ;;  %s170_s24 = smov 96   ;;  %vm65_vm4 = vcmask 851712   ;;  %vm71_vm5 = vcmask 786112  }
   0x7   :  { %s171_s25 = smov 88   ;;  %s172_s26 = smov 80   ;;  %vm77_vm6 = vcmask 720512   ;;  %vm83_vm7 = vcmask 654912   ;;  %vm89_vm8 = vcmask 589312   ;;  %vm95_vm9 = vcmask 523712  }
   0x8   :  { %s173_s27 = smov 72   ;;  %s174_s28 = smov 64   ;;  %vm101_vm10 = vcmask 458112   ;;  %vm107_vm11 = vcmask 392512   ;;  %vm113_vm12 = vcmask 326912   ;;  %vm119_vm13 = vcmask 261312  }
   0x9   :  { %v44_v8 = vld [vmem:[#allocation1 + $0x39] sm:$0x1]   ;;  %v56_v9 = vld [vmem:[#allocation1 + $0x31] sm:$0x1]   ;;  %v50_v10 = vld [vmem:[#allocation1 + $0x38] sm:$0x1]  }
   0xa   :  { %45 = vrot.lane.b32.xlu0 %v44_v8, %s167_s0  ;;  %57 = vrot.lane.b32.xlu1 %v56_v9, %s168_s22  ;;  %v62_v11 = vld [vmem:[#allocation1 + $0x30] sm:$0x1]   ;;  %v68_v13 = vld [vmem:[#allocation1 + $0x29] sm:$0x1]   ;;  %v74_v14 = vld [vmem:[#allocation1 + $0x28] sm:$0x1]  }
   0xb   :  { %v80_v15 = vld [vmem:[#allocation1 + $0x21] sm:$0x1]   ;;  %v86_v16 = vld [vmem:[#allocation1 + $0x20] sm:$0x1]   ;;  %v92_v17 = vld [vmem:[#allocation1 + $0x19] sm:$0x1]  }
   0xc   :  { %v98_v18 = vld [vmem:[#allocation1 + $0x18] sm:$0x1]   ;;  %s175_s29 = smov 56   ;;  %s176_s30 = smov 48   ;;  %v104_v19 = vld [vmem:[#allocation1 + $0x11] sm:$0x1]  }
   0xd   :  { %v40_v12 = vld [vmem:[#allocation1] sm:$0x1]   ;;  %v110_v20 = vld [vmem:[#allocation1 + $0x10] sm:$0x1]   ;;  %s177_s2 = smov 40   ;;  %s178_s3 = smov 32  }
   0xe   :  { %51 = vrot.lane.b32.xlu0 %v50_v10, %s169_s23  ;;  %63 = vrot.lane.b32.xlu1 %v62_v11, %s170_s24  ;;  %42 = vst.msk [vmem:[#allocation0] sm:$0x1] %vm41_vm0, %v40_v12   ;;  %v116_v21 = vld [vmem:[#allocation1 + $0x9] sm:$0x1]   ;;  %v122_v22 = vld [vmem:[#allocation1 + $0x8] sm:$0x1]  }
   0xf   :  { %s179_s4 = smov 24   ;;  %s180_s5 = smov 16   ;;  %v128_v23 = vld [vmem:[#allocation1 + $0x1] sm:$0x1]   ;;  %vm125_vm14 = vcmask 195712   ;;  %vm131_vm15 = vcmask 130112  }
  0x10   :  { %s181_s6 = smov 8  }
  0x12   :  { %69 = vrot.lane.b32.xlu0 %v68_v13, %s171_s25  ;;  %75 = vrot.lane.b32.xlu1 %v74_v14, %s172_s26 }
  0x16   :  { %81 = vrot.lane.b32.xlu0 %v80_v15, %s173_s27  ;;  %87 = vrot.lane.b32.xlu1 %v86_v16, %s174_s28 }
  0x1a   :  { %93 = vrot.lane.b32.xlu0 %v92_v17, %s175_s29  ;;  %99 = vrot.lane.b32.xlu1 %v98_v18, %s176_s30 }
  0x1e   :  { %105 = vrot.lane.b32.xlu0 %v104_v19, %s177_s2  ;;  %111 = vrot.lane.b32.xlu1 %v110_v20, %s178_s3 }
  0x22   :  { %117 = vrot.lane.b32.xlu0 %v116_v21, %s179_s4  ;;  %123 = vrot.lane.b32.xlu1 %v122_v22, %s180_s5 }
  0x26   :  { %129 = vrot.lane.b32.xlu0 %v128_v23, %s181_s6 }
  0x7c   :  { %v46_v24 = vpop.permute.xlu0 %45   ;;  %v58_v25 = vpop.permute.xlu1 %57  }
  0x7d   :  { %48 = vst.msk [vmem:[#allocation0] sm:$0x1] %vm47_vm1, %v46_v24  }
  0x80   :  { %v52_v26 = vpop.permute.xlu0 %51   ;;  %v64_v27 = vpop.permute.xlu1 %63  }
  0x81   :  { %54 = vst.msk [vmem:[#allocation0] sm:$0x1] %vm53_vm2, %v52_v26  }
  0x82   :  { %60 = vst.msk [vmem:[#allocation0] sm:$0x1] %vm59_vm3, %v58_v25  }
  0x83   :  { %66 = vst.msk [vmem:[#allocation0] sm:$0x1] %vm65_vm4, %v64_v27  }
  0x84   :  { %v70_v28 = vpop.permute.xlu0 %69   ;;  %v76_v29 = vpop.permute.xlu1 %75  }
  0x85   :  { %72 = vst.msk [vmem:[#allocation0] sm:$0x1] %vm71_vm5, %v70_v28  }
  0x86   :  { %78 = vst.msk [vmem:[#allocation0] sm:$0x1] %vm77_vm6, %v76_v29  }
  0x88   :  { %v82_v30 = vpop.permute.xlu0 %81   ;;  %v88_v31 = vpop.permute.xlu1 %87  }
  0x89   :  { %84 = vst.msk [vmem:[#allocation0] sm:$0x1] %vm83_vm7, %v82_v30  }
  0x8a   :  { %90 = vst.msk [vmem:[#allocation0] sm:$0x1] %vm89_vm8, %v88_v31  }
  0x8c   :  { %v94_v32 = vpop.permute.xlu0 %93   ;;  %v100_v33 = vpop.permute.xlu1 %99  }
  0x8d   :  { %96 = vst.msk [vmem:[#allocation0] sm:$0x1] %vm95_vm9, %v94_v32  }
  0x8e   :  { %102 = vst.msk [vmem:[#allocation0] sm:$0x1] %vm101_vm10, %v100_v33  }
  0x90   :  { %v106_v34 = vpop.permute.xlu0 %105   ;;  %v112_v35 = vpop.permute.xlu1 %111  }
  0x91   :  { %108 = vst.msk [vmem:[#allocation0] sm:$0x1] %vm107_vm11, %v106_v34  }
  0x92   :  { %114 = vst.msk [vmem:[#allocation0] sm:$0x1] %vm113_vm12, %v112_v35  }
  0x94   :  { %v118_v36 = vpop.permute.xlu0 %117   ;;  %v124_v37 = vpop.permute.xlu1 %123  }
  0x95   :  { %120 = vst.msk [vmem:[#allocation0] sm:$0x1] %vm119_vm13, %v118_v36  }
  0x96   :  { %126 = vst.msk [vmem:[#allocation0] sm:$0x1] %vm125_vm14, %v124_v37  }
  0x98   :  { %v130_v38 = vpop.permute.xlu0 %129  }
  0x99   :  { %132 = vst.msk [vmem:[#allocation0] sm:$0x1] %vm131_vm15, %v130_v38  }
  0xa0   :  { %v136_v39 = vld [vmem:[#allocation0] sm:$0x1] }
  0xa1   :  { %138 = vst [vmem:[%s220_s1] sm:$0x1] %v136_v39 }

// kernel: squeeze.11
= control target key start
LH: loop header
LB: loop body
LE: loop exit
PB: predicated region body
PF: predicated region fallthrough
CT: control target
= control target key end

     0   :  { %vm16_vm0 = vcmask 162816   ;;  %s61_s0 = inlined_call_operand.vmem [shape: f32[20,3,3], index: 0, kind: input, shape index: {}]   ;;  %s62_s1 = inlined_call_operand.vmem [shape: f32[20,9], index: 1, kind: output, shape index: {}]  }
   0x1   :  { %v29_v0 = vld [vmem:[%s61_s0 + $0x8] sm:$0xf]  ;;  %v30_v1 = vld [vmem:[%s61_s0 + $0x4] sm:$0xf]  ;;  %v13_v2 = vld [vmem:[%s61_s0] sm:$0xf] }
   0x2   :  { %8 = vst [vmem:[#allocation0 + $0x10] sm:$0xf] %v29_v0  ;;  %12 = vst [vmem:[#allocation0 + $0x8] sm:$0xf] %v30_v1 }
   0x3   :  { %14 = vst [vmem:[#allocation0] sm:$0xf] %v13_v2 }
   0x9   :  { %v19_v4 = vld [vmem:[#allocation0 + $0x8] sm:$0x7]   ;;  %v24_v5 = vld [vmem:[#allocation0 + $0x10] sm:$0x7]  }
   0xa   :  { %v15_v3 = vld [vmem:[#allocation0] sm:$0x7]   ;;  %31 = vst.msk [vmem:[%s62_s1 + $0x3] sm:$0x7] %vm16_vm0, %v19_v4   ;;  %32 = vst.msk [vmem:[%s62_s1 + $0x6] sm:$0x7] %vm16_vm0, %v24_v5  }
   0xb   :  { %17 = vst.msk [vmem:[%s62_s1] sm:$0x7] %vm16_vm0, %v15_v3  }

// kernel: operon_transformer_classifier_forward.1
= control target key start
LH: loop header
LB: loop body
LE: loop exit
PB: predicated region body
PF: predicated region fallthrough
CT: control target
= control target key end

     0   :  { %11 = vsyncpa [#allocation3], 0  ;;  %s2684_s0 = inlined_call_operand.vmem [shape: s32[128,4], index: 0, kind: input, shape index: {}]   ;;  %s2685_s1 = inlined_call_operand.vmem [shape: f32[48,65], index: 1, kind: input, shape index: {}]   ;;  %s2686_s2 = inlined_call_operand.vmem [shape: f32[65,20], index: 2, kind: input, shape index: {}]   ;;  %s2687_s3 = inlined_call_operand.vmem [shape: f32[20,9], index: 3, kind: input, shape index: {}]   ;;  %s2688_s4 = inlined_call_operand.vmem [shape: f32[128,9], index: 4, kind: input, shape index: {}]   ;;  %s2689_s5 = inlined_call_operand.vmem [shape: f32[2], index: 5, kind: input, shape index: {}]   ;;  %s2690_s6 = inlined_call_operand.vmem [shape: f32[8,1], index: 6, kind: output, shape index: {}]  }
   0x1   :  { %s28_s23 = sshll.u32 %s2689_s5, 4  ;;  %s29_s23 = int_to_ptr.vmem [resolvable:$true] %s28_s23 }
   0x2   :  { %s1681_s24 = scalar_lea.vmem %s29_s23, 16  ;;  %p1686_p1 = scmp.lt.s32.totalorder %s29_s23, %s29_s23 }
   0x3   :  { %p1682_p0 = scmp.ne.s32.totalorder %s29_s23, %s1681_s24  ;;  %p1687_p2 = scmp.lt.s32.totalorder %s1681_s24, %s1681_s24 }
   0x5   :  { %p1688_p3 = por %p1687_p2, %p1686_p1 }
   0x7   :  { %p1689_p4 = pnand %p1688_p3, %p1682_p0 }
   0x9   :  { %1692 = shalt.err (!%p1689_p4)
}
   0xa   :  { %s1695_s25 = smov [#allocation2]  }
   0xb   :  { %31 = dma.vmem_to_smem %s29_s23, 16, %s1695_s25, [#allocation3]  }
   0xc   :  { %1693 = dma.done.wait [#allocation3], 16  }
   0xd   :  { %1694 = vsyncadd [#allocation3], 4294967280 }
   0xe   :  { %35 = sfence }
   0xf   :  { %v37_v0 = vld [vmem:[%s2684_s0 + $0x8] sm:$0xff]  ;;  %v36_v1 = vld [vmem:[%s2684_s0] sm:$0xff]  ;;  %v1696_v2 = vmov 1   ;;  %v1697_v3 = vmov 0   ;;  %v39_v4 = vld [vmem:[%s2684_s0 + $0x18] sm:$0xff]  ;;  %v1698_v6 = vmov 2   ;;  %v52_v44 = vlaneseq }
  0x10   :  { %1635 = vset.pattern.permute.xlu0 %v1696_v2  ;;  %1636 = vset.pattern.permute.xlu1 %v1697_v3  ;;  %v1754_v5 = vld [vmem:[%s2684_s0 + $0x20] sm:$0xff]  ;;  %v38_v7 = vld [vmem:[%s2684_s0 + $0x10] sm:$0xff]  ;;  %v1699_v8 = vmov 3   ;;  %v41_v9 = vld [vmem:[%s2684_s0 + $0x28] sm:$0xff]  ;;  %v1700_v60 = vmov 0.0   ;;  %s1418_s17 = sld [smem:[#allocation2 + $0x1]] }
  0x11   :  { %58 = vperm.xlu1 %1636, %v37_v0   ;;  %119 = vperm.xlu0 %1635, %v36_v1   ;;  %v1769_v10 = vld [vmem:[%s2684_s0 + $0x40] sm:$0xff]  ;;  %v1775_v11 = vld [vmem:[%s2684_s0 + $0x58] sm:$0xff]  ;;  %v1789_v13 = vld [vmem:[%s2684_s0 + $0x50] sm:$0xff]  ;;  %v1888_v47 = vand.u32 127, %v52_v44 }
  0x12   :  { %v43_v12 = vld [vmem:[%s2684_s0 + $0x38] sm:$0xff]  ;;  %v1796_v14 = vld [vmem:[%s2684_s0 + $0x68] sm:$0xff]  ;;  %v407_v15 = vld [vmem:[%s2685_s1] sm:$0xff] }
  0x13   :  { %v408_v16 = vld [vmem:[%s2685_s1 + $0x8] sm:$0xff]  ;;  %v409_v18 = vld [vmem:[%s2685_s1 + $0x10] sm:$0xff]  ;;  %v410_v19 = vld [vmem:[%s2685_s1 + $0x18] sm:$0xff]  ;;  %vm358_vm8 = vcmp.eq.s32.totalorder %v1888_v47, 46 }
  0x14   :  { %v1593_v17 = vpack.c.bf16 %v408_v16, %v407_v15  ;;  %v1597_v20 = vpack.c.bf16 %v410_v19, %v409_v18  ;;  %v411_v21 = vld [vmem:[%s2685_s1 + $0x20] sm:$0xff]  ;;  %v412_v22 = vld [vmem:[%s2685_s1 + $0x28] sm:$0xff]  ;;  %v1829_v24 = vld [vmem:[%s2684_s0 + $0x70] sm:$0xff] }
  0x15   :  { %1637 = vset.pattern.permute.xlu1 %v1696_v2  ;;  %128 = vperm.xlu0 %1635, %v39_v4   ;;  %v1601_v23 = vpack.c.bf16 %v412_v22, %v411_v21  ;;  %v42_v25 = vld [vmem:[%s2684_s0 + $0x30] sm:$0xff]  ;;  %v45_v26 = vld [vmem:[%s2684_s0 + $0x48] sm:$0xff]  ;;  %v1845_v27 = vld [vmem:[%s2684_s0 + $0x78] sm:$0xff] }
  0x16   :  { %122 = vperm.xlu1 %1637, %v37_v0   ;;  %1594 = vmatprep.subr.bf16.mxu0 %v1593_v17  ;;  %v48_v37 = vld [vmem:[%s2684_s0 + $0x60] sm:$0xff]  ;;  %v614_v18 = vld [vmem:[%s2686_s2 + $0x38] sm:$0xff] }
  0x17   :  { %1596 = vmatpush3.bf16.msra.mxu0 %v1593_v17  ;;  %v613_v17 = vld [vmem:[%s2686_s2 + $0x30] sm:$0xff] }
  0x18   :  { %1598 = vmatprep.subr.bf16.mxu0 %v1597_v20 }
  0x19   :  { %131 = vperm.xlu0 %1635, %v1754_v5  }
  0x1a   :  { %1638 = vset.pattern.permute.xlu1 %v1698_v6 }
  0x1b   :  { %199 = vperm.xlu1 %1638, %v36_v1   ;;  %1600 = vmatpush3.bf16.msra.mxu0 %v1597_v20  ;;  %v1617_v20 = vpack.c.bf16 %v614_v18, %v613_v17  ;;  %v846_v17 = vld [vmem:[%s2687_s3] sm:$0xff]  ;;  %v847_v18 = vld [vmem:[%s2687_s3 + $0x8] sm:$0xff] }
  0x1c   :  { %1602 = vmatprep.subr.bf16.mxu0 %v1601_v23 }
  0x1d   :  { %1645 = vset.pattern.permute.xlu0 %v1699_v8 }
  0x1e   :  { %285 = vperm.xlu0 %1645, %v38_v7  }
  0x1f   :  { %1639 = vset.pattern.permute.xlu1 %v1699_v8  ;;  %1604 = vmatpush3.bf16.msra.mxu0 %v1601_v23 }
  0x20   :  { %279 = vperm.xlu1 %1639, %v36_v1  }
  0x22   :  { %294 = vperm.xlu0 %1645, %v41_v9  }
  0x24   :  { %282 = vperm.xlu1 %1639, %v37_v0  }
  0x26   :  { %303 = vperm.xlu0 %1645, %v1769_v10  }
  0x28   :  { %1640 = vset.pattern.permute.xlu1 %v1696_v2 }
  0x29   :  { %125 = vperm.xlu1 %1640, %v38_v7  }
  0x2a   :  { %312 = vperm.xlu0 %1645, %v1775_v11  }
  0x2d   :  { %1641 = vset.pattern.permute.xlu1 %v1697_v3 }
  0x2e   :  { %64 = vperm.xlu1 %1641, %v39_v4   ;;  %1661 = vset.pattern.permute.xlu0 %v1698_v6 }
  0x2f   :  { %202 = vperm.xlu0 %1661, %v37_v0  }
  0x32   :  { %1642 = vset.pattern.permute.xlu1 %v1698_v6 }
  0x33   :  { %205 = vperm.xlu1 %1642, %v38_v7   ;;  %211 = vperm.xlu0 %1661, %v1754_v5  }
  0x37   :  { %208 = vperm.xlu1 %1642, %v39_v4   ;;  %220 = vperm.xlu0 %1661, %v43_v12  }
  0x3b   :  { %1643 = vset.pattern.permute.xlu1 %v1699_v8  ;;  %229 = vperm.xlu0 %1661, %v1789_v13  }
  0x3c   :  { %288 = vperm.xlu1 %1643, %v39_v4  }
  0x3f   :  { %238 = vperm.xlu0 %1661, %v1796_v14  }
  0x40   :  { %1644 = vset.pattern.permute.xlu1 %v1697_v3 }
  0x41   :  { %67 = vperm.xlu1 %1644, %v1754_v5  }
  0x43   :  { %1665 = vset.pattern.permute.xlu0 %v1697_v3 }
  0x44   :  { %55 = vperm.xlu0 %1665, %v36_v1  }
  0x45   :  { %70 = vperm.xlu1 %1644, %v41_v9  }
  0x48   :  { %61 = vperm.xlu0 %1665, %v38_v7   ;;  %v607_v7 = vld [vmem:[%s2686_s2] sm:$0xff] }
  0x49   :  { %1646 = vset.pattern.permute.xlu1 %v1696_v2 }
  0x4a   :  { %134 = vperm.xlu1 %1646, %v41_v9  }
  0x4c   :  { %76 = vperm.xlu0 %1665, %v43_v12  }
  0x4e   :  { %1647 = vset.pattern.permute.xlu1 %v1698_v6 }
  0x4f   :  { %214 = vperm.xlu1 %1647, %v41_v9   ;;  %v609_v9 = vld [vmem:[%s2686_s2 + $0x10] sm:$0xff] }
  0x50   :  { %79 = vperm.xlu0 %1665, %v1769_v10  }
  0x53   :  { %1648 = vset.pattern.permute.xlu1 %v1699_v8 }
  0x54   :  { %291 = vperm.xlu1 %1648, %v1754_v5   ;;  %94 = vperm.xlu0 %1665, %v1796_v14  }
  0x58   :  { %1649 = vset.pattern.permute.xlu1 %v1697_v3  ;;  %97 = vperm.xlu0 %1665, %v1829_v24  }
  0x59   :  { %73 = vperm.xlu1 %1649, %v42_v25  }
  0x5c   :  { %1667 = vset.pattern.permute.xlu0 %v1696_v2 }
  0x5d   :  { %1650 = vset.pattern.permute.xlu1 %v1696_v2  ;;  %146 = vperm.xlu0 %1667, %v45_v26  }
  0x5e   :  { %137 = vperm.xlu1 %1650, %v42_v25  }
  0x61   :  { %149 = vperm.xlu0 %1667, %v1789_v13  }
  0x62   :  { %140 = vperm.xlu1 %1650, %v43_v12  }
  0x65   :  { %164 = vperm.xlu0 %1667, %v1845_v27  }
  0x66   :  { %1651 = vset.pattern.permute.xlu1 %v1698_v6 }
  0x67   :  { %217 = vperm.xlu1 %1651, %v42_v25  }
  0x69   :  { %1671 = vset.pattern.permute.xlu0 %v1699_v8 }
  0x6a   :  { %321 = vperm.xlu0 %1671, %v1829_v24  }
  0x6b   :  { %1652 = vset.pattern.permute.xlu1 %v1699_v8 }
  0x6c   :  { %297 = vperm.xlu1 %1652, %v42_v25  }
  0x70   :  { %300 = vperm.xlu1 %1652, %v43_v12  }
  0x74   :  { %1653 = vset.pattern.permute.xlu1 %v1696_v2 }
  0x75   :  { %143 = vperm.xlu1 %1653, %v1769_v10  }
  0x79   :  { %1654 = vset.pattern.permute.xlu1 %v1697_v3 }
  0x7a   :  { %82 = vperm.xlu1 %1654, %v45_v26  }
  0x7e   :  { %1655 = vset.pattern.permute.xlu1 %v1698_v6 }
  0x7f   :  { %223 = vperm.xlu1 %1655, %v1769_v10  }
  0x83   :  { %226 = vperm.xlu1 %1655, %v45_v26  }
  0x87   :  { %1656 = vset.pattern.permute.xlu1 %v1699_v8 }
  0x88   :  { %306 = vperm.xlu1 %1656, %v45_v26  }
  0x8c   :  { %1657 = vset.pattern.permute.xlu1 %v1697_v3 }
  0x8d   :  { %85 = vperm.xlu1 %1657, %v1789_v13  }
  0x90   :  { %v59_v28 = vpop.permute.xlu1 %58  ;;  %v1860_v29 = vpop.permute.xlu0 %119 }
  0x91   :  { %88 = vperm.xlu1 %1657, %v1775_v11   ;;  %vm103_vm2 = vcmp.eq.s32.totalorder %v1888_v47, %v59_v28  ;;  %vm166_vm13 = vcmp.eq.s32.totalorder %v1888_v47, %v1860_v29 }
  0x94   :  { %v129_v30 = vpop.permute.xlu0 %128 }
  0x95   :  { %v123_v31 = vpop.permute.xlu1 %122  ;;  %1658 = vset.pattern.permute.xlu1 %v1696_v2  ;;  %vm169_vm5 = vcmp.eq.s32.totalorder %v1888_v47, %v129_v30 }
  0x96   :  { %152 = vperm.xlu1 %1658, %v1775_v11   ;;  %vm167_vm0 = vcmp.eq.s32.totalorder %v1888_v47, %v123_v31 }
  0x97   :  { %vm183_vm3 = vmor %vm103_vm2, %vm167_vm0 }
  0x98   :  { %v1865_v32 = vpop.permute.xlu0 %131 }
  0x9a   :  { %1659 = vset.pattern.permute.xlu1 %v1698_v6  ;;  %v200_v33 = vpop.permute.xlu1 %199 }
  0x9b   :  { %232 = vperm.xlu1 %1659, %v1775_v11   ;;  %vm246_vm2 = vcmp.eq.s32.totalorder %v1888_v47, %v200_v33  ;;  %v610_v11 = vld [vmem:[%s2686_s2 + $0x18] sm:$0xff] }
  0x9c   :  { %v1609_v12 = vpack.c.bf16 %v610_v11, %v609_v9 }
  0x9d   :  { %v1869_v34 = vpop.permute.xlu0 %285 }
  0x9f   :  { %1660 = vset.pattern.permute.xlu1 %v1699_v8  ;;  %v280_v35 = vpop.permute.xlu1 %279 }
  0xa0   :  { %309 = vperm.xlu1 %1660, %v1789_v13   ;;  %v611_v13 = vld [vmem:[%s2686_s2 + $0x20] sm:$0xff] }
  0xa1   :  { %v1873_v36 = vpop.permute.xlu0 %294 }
  0xa3   :  { %v283_v38 = vpop.permute.xlu1 %282 }
  0xa4   :  { %1662 = vset.pattern.permute.xlu1 %v1697_v3  ;;  %vm327_vm6 = vcmp.eq.s32.totalorder %v1888_v47, %v283_v38 }
  0xa5   :  { %91 = vperm.xlu1 %1662, %v48_v37   ;;  %v1879_v39 = vpop.permute.xlu0 %303 }
  0xa8   :  { %v126_v40 = vpop.permute.xlu1 %125 }
  0xa9   :  { %1663 = vset.pattern.permute.xlu1 %v1696_v2  ;;  %v1882_v41 = vpop.permute.xlu0 %312 }
  0xaa   :  { %155 = vperm.xlu1 %1663, %v48_v37  }
  0xad   :  { %v65_v42 = vpop.permute.xlu1 %64 }
  0xae   :  { %158 = vperm.xlu1 %1663, %v1796_v14   ;;  %v203_v43 = vpop.permute.xlu0 %202  ;;  %vm105_vm7 = vcmp.eq.s32.totalorder %v1888_v47, %v65_v42 }
  0xaf   :  { %vm247_vm1 = vcmp.eq.s32.totalorder %v1888_v47, %v203_v43  ;;  %vm185_vm11 = vmor %vm105_vm7, %vm169_vm5  ;;  %vm413_vm7 = vcmask 392192  }
  0xb0   :  { %vm263_vm4 = vmor %vm183_vm3, %vm247_vm1 }
  0xb1   :  { %vm343_vm9 = vmor %vm263_vm4, %vm327_vm6  ;;  %vm326_vm4 = vcmp.eq.s32.totalorder %v1888_v47, %v280_v35 }
  0xb2   :  { %1664 = vset.pattern.permute.xlu1 %v1698_v6  ;;  %v206_v45 = vpop.permute.xlu1 %205  ;;  %v1886_v46 = vpop.permute.xlu0 %211  ;;  %vm1913_vm14 = vmor %vm343_vm9, %vm358_vm8  ;;  %vm328_vm9 = vcmp.eq.s32.totalorder %v1888_v47, %v1869_v34 }
  0xb3   :  { %235 = vperm.xlu1 %1664, %v48_v37   ;;  %v1353_v62 = vsel %vm1913_vm14, 1.0, %v1700_v60 }
  0xb6   :  { %v209_v48 = vpop.permute.xlu1 %208  ;;  %v1890_v49 = vpop.permute.xlu0 %220 }
  0xb7   :  { %1666 = vset.pattern.permute.xlu1 %v1699_v8  ;;  %vm249_vm10 = vcmp.eq.s32.totalorder %v1888_v47, %v209_v48 }
  0xb8   :  { %315 = vperm.xlu1 %1666, %v48_v37   ;;  %vm265_vm15 = vmor %vm185_vm11, %vm249_vm10  ;;  %vm168_vm10 = vcmp.eq.s32.totalorder %v1888_v47, %v126_v40 }
  0xba   :  { %v1896_v50 = vpop.permute.xlu0 %229 }
  0xbb   :  { %v289_v51 = vpop.permute.xlu1 %288 }
  0xbc   :  { %318 = vperm.xlu1 %1666, %v1796_v14   ;;  %vm329_vm12 = vcmp.eq.s32.totalorder %v1888_v47, %v289_v51  ;;  %v612_v14 = vld [vmem:[%s2686_s2 + $0x28] sm:$0xff] }
  0xbd   :  { %vm1917_vm0 = vmor %vm265_vm15, %vm329_vm12  ;;  %v1613_v16 = vpack.c.bf16 %v612_v14, %v611_v13 }
  0xbe   :  { %v1902_v52 = vpop.permute.xlu0 %238 }
  0xc0   :  { %1668 = vset.pattern.permute.xlu1 %v1696_v2  ;;  %v68_v53 = vpop.permute.xlu1 %67 }
  0xc1   :  { %161 = vperm.xlu1 %1668, %v1829_v24  }
  0xc3   :  { %v56_v55 = vpop.permute.xlu0 %55 }
  0xc4   :  { %vm102_vm1 = vcmp.eq.s32.totalorder %v1888_v47, %v56_v55  ;;  %v71_v57 = vpop.permute.xlu1 %70 }
  0xc5   :  { %vm182_vm3 = vmor %vm102_vm1, %vm166_vm13  ;;  %1669 = vset.pattern.permute.xlu1 %v1697_v3  ;;  %vm248_vm13 = vcmp.eq.s32.totalorder %v1888_v47, %v206_v45  ;;  %v615_v45 = vld [vmem:[%s2686_s2 + $0x40] sm:$0x1] }
  0xc6   :  { %vm262_vm5 = vmor %vm182_vm3, %vm246_vm2  ;;  %100 = vperm.xlu1 %1669, %v1845_v27   ;;  %vm170_vm2 = vcmp.eq.s32.totalorder %v1888_v47, %v1865_v32  ;;  %vm106_vm3 = vcmp.eq.s32.totalorder %v1888_v47, %v68_v53 }
  0xc7   :  { %v62_v58 = vpop.permute.xlu0 %61  ;;  %vm342_vm6 = vmor %vm262_vm5, %vm326_vm4 }
  0xc8   :  { %vm104_vm11 = vcmp.eq.s32.totalorder %v1888_v47, %v62_v58  ;;  %vm359_vm12 = vmor %vm342_vm6, %vm358_vm8 }
  0xc9   :  { %vm184_vm15 = vmor %vm104_vm11, %vm168_vm10  ;;  %v135_v59 = vpop.permute.xlu1 %134  ;;  %v1352_v61 = vsel %vm359_vm12, 1.0, %v1700_v60  ;;  %vm331_vm10 = vcmp.eq.s32.totalorder %v1888_v47, %v1873_v36 }
  0xca   :  { %vm264_vm1 = vmor %vm184_vm15, %vm248_vm13  ;;  %1670 = vset.pattern.permute.xlu1 %v1698_v6  ;;  %1497 = vmatprep.mubr.msk.f32.mxu0 %vm413_vm7, %v1352_v61  ;;  %vm171_vm14 = vcmp.eq.s32.totalorder %v1888_v47, %v135_v59  ;;  %vm250_vm13 = vcmp.eq.s32.totalorder %v1888_v47, %v1886_v46 }
  0xcb   :  { %vm344_vm4 = vmor %vm264_vm1, %vm328_vm9  ;;  %241 = vperm.xlu1 %1670, %v1829_v24   ;;  %1498 = vmatmul.mubr.msk.f32.vlgmr.msra.gmra.mrb[0].mxu0 %vm413_vm7, %v1353_v62  ;;  %vm107_vm9 = vcmp.eq.s32.totalorder %v1888_v47, %v71_v57  ;;  %v77_v21 = vpop.permute.xlu0 %76 }
  0xcc   :  { %vm362_vm5 = vmor %vm1917_vm0, %vm358_vm8 }
  0xcd   :  { %vm361_vm6 = vmor %vm344_vm4, %vm358_vm8  ;;  %v1355_v2 = vsel %vm362_vm5, 1.0, %v1700_v60 }
  0xce   :  { %vm1956_vm11 = vmor %vm106_vm3, %vm170_vm2  ;;  %v215_v0 = vpop.permute.xlu1 %214  ;;  %v1354_v1 = vsel %vm361_vm6, 1.0, %v1700_v60 }
  0xcf   :  { %vm187_vm12 = vmor %vm107_vm9, %vm171_vm14  ;;  %vm251_vm0 = vcmp.eq.s32.totalorder %v1888_v47, %v215_v0  ;;  %1500 = vmatprep.mubr.msk.f32.mxu0 %vm413_vm7, %v1354_v1  ;;  %244 = vperm.xlu1 %1670, %v1845_v27   ;;  %v80_v24 = vpop.permute.xlu0 %79 }
  0xd0   :  { %vm267_vm15 = vmor %vm187_vm12, %vm251_vm0  ;;  %1501 = vmatmul.mubr.msk.f32.gmra.mrb[2].mxu0 %vm413_vm7, %v1355_v2 }
  0xd1   :  { %vm347_vm1 = vmor %vm267_vm15, %vm331_vm10 }
  0xd2   :  { %vm266_vm2 = vmor %vm1956_vm11, %vm250_vm13  ;;  %vm109_vm11 = vcmp.eq.s32.totalorder %v1888_v47, %v77_v21 }
  0xd3   :  { %1672 = vset.pattern.permute.xlu1 %v1699_v8  ;;  %v292_v3 = vpop.permute.xlu1 %291  ;;  %vm364_vm3 = vmor %vm347_vm1, %vm358_vm8  ;;  %v608_v8 = vld [vmem:[%s2686_s2 + $0x8] sm:$0xff]  ;;  %v2023_v29 = vpop.permute.xlu0 %94 }
  0xd4   :  { %vm330_vm4 = vcmp.eq.s32.totalorder %v1888_v47, %v292_v3  ;;  %324 = vperm.xlu1 %1672, %v1845_v27   ;;  %v1357_v6 = vsel %vm364_vm3, 1.0, %v1700_v60  ;;  %v1605_v10 = vpack.c.bf16 %v608_v8, %v607_v7 }
  0xd5   :  { %vm346_vm5 = vmor %vm266_vm2, %vm330_vm4  ;;  %vm253_vm2 = vcmp.eq.s32.totalorder %v1888_v47, %v1890_v49 }
  0xd6   :  { %vm363_vm14 = vmor %vm346_vm5, %vm358_vm8  ;;  %1606 = vmatprep.subr.bf16.mxu1 %v1605_v10 }
  0xd7   :  { %v1356_v4 = vsel %vm363_vm14, 1.0, %v1700_v60  ;;  %1608 = vmatpush3.bf16.msra.mxu1 %v1605_v10  ;;  %v2025_v31 = vpop.permute.xlu0 %97 }
  0xd8   :  { %v74_v5 = vpop.permute.xlu1 %73  ;;  %1503 = vmatprep.mubr.msk.f32.mxu0 %vm413_vm7, %v1356_v4  ;;  %1610 = vmatprep.subr.bf16.mxu1 %v1609_v12 }
  0xd9   :  { %1504 = vmatmul.mubr.msk.f32.gmra.mrb[4].mxu0 %vm413_vm7, %v1357_v6  ;;  %vm108_vm9 = vcmp.eq.s32.totalorder %v1888_v47, %v74_v5 }
  0xdb   :  { %1612 = vmatpush3.bf16.msra.mxu1 %v1609_v12 }
  0xdc   :  { %1614 = vmatprep.subr.bf16.mxu1 %v1613_v16  ;;  %v147_v33 = vpop.permute.xlu0 %146 }
  0xdd   :  { %v138_v15 = vpop.permute.xlu1 %137 }
  0xde   :  { %vm172_vm6 = vcmp.eq.s32.totalorder %v1888_v47, %v138_v15 }
  0xdf   :  { %1616 = vmatpush3.bf16.msra.mxu1 %v1613_v16  ;;  %vm188_vm0 = vmor %vm108_vm9, %vm172_vm6 }
  0xe0   :  { %1618 = vmatprep.subr.bf16.mxu1 %v1617_v20  ;;  %v150_v40 = vpop.permute.xlu0 %149 }
  0xe1   :  { %v141_v19 = vpop.permute.xlu1 %140 }
  0xe2   :  { %vm173_vm10 = vcmp.eq.s32.totalorder %v1888_v47, %v141_v19  ;;  %v1621_v19 = vpack.c.bf16 %v847_v18, %v846_v17 }
  0xe3   :  { %1620 = vmatpush3.bf16.msra.mxu1 %v1617_v20  ;;  %vm189_vm13 = vmor %vm109_vm11, %vm173_vm10  ;;  %vm110_vm11 = vcmp.eq.s32.totalorder %v1888_v47, %v80_v24 }
  0xe4   :  { %vm269_vm5 = vmor %vm189_vm13, %vm253_vm2  ;;  %v165_v58 = vpop.permute.xlu0 %164  ;;  %1622 = vmatprep.subr.bf16.mxu0 %v1621_v19 }
  0xe5   :  { %1624 = vmatpush3.bf16.msra.mxu0 %v1621_v19 }
  0xe6   :  { %v218_v22 = vpop.permute.xlu1 %217 }
  0xe7   :  { %vm252_vm12 = vcmp.eq.s32.totalorder %v1888_v47, %v218_v22 }
  0xe8   :  { %vm268_vm15 = vmor %vm188_vm0, %vm252_vm12  ;;  %vm334_vm12 = vcmp.eq.s32.totalorder %v1888_v47, %v1879_v39 }
  0xeb   :  { %v298_v23 = vpop.permute.xlu1 %297 }
  0xec   :  { %vm332_vm1 = vcmp.eq.s32.totalorder %v1888_v47, %v298_v23 }
  0xed   :  { %vm348_vm3 = vmor %vm268_vm15, %vm332_vm1 }
  0xee   :  { %vm365_vm4 = vmor %vm348_vm3, %vm358_vm8 }
  0xef   :  { %v301_v25 = vpop.permute.xlu1 %300  ;;  %v1358_v26 = vsel %vm365_vm4, 1.0, %v1700_v60  ;;  %vm175_vm4 = vcmp.eq.s32.totalorder %v1888_v47, %v147_v33 }
  0xf0   :  { %vm333_vm14 = vcmp.eq.s32.totalorder %v1888_v47, %v301_v25  ;;  %1506 = vmatprep.mubr.msk.f32.mxu0 %vm413_vm7, %v1358_v26 }
  0xf1   :  { %vm349_vm6 = vmor %vm269_vm5, %vm333_vm14 }
  0xf2   :  { %vm366_vm10 = vmor %vm349_vm6, %vm358_vm8 }
  0xf3   :  { %v1359_v27 = vsel %vm366_vm10, 1.0, %v1700_v60 }
  0xf4   :  { %v144_v28 = vpop.permute.xlu1 %143  ;;  %1507 = vmatmul.mubr.msk.f32.gmra.mrb[6].mxu0 %vm413_vm7, %v1359_v27 }
  0xf5   :  { %vm174_vm9 = vcmp.eq.s32.totalorder %v1888_v47, %v144_v28  ;;  %v848_v28 = vld [vmem:[%s2687_s3 + $0x10] sm:$0xf] }
  0xf6   :  { %vm190_vm0 = vmor %vm110_vm11, %vm174_vm9 }
  0xf9   :  { %v83_v30 = vpop.permute.xlu1 %82 }
  0xfa   :  { %vm111_vm3 = vcmp.eq.s32.totalorder %v1888_v47, %v83_v30 }
  0xfb   :  { %vm191_vm14 = vmor %vm111_vm3, %vm175_vm4  ;;  %vm337_vm4 = vcmp.eq.s32.totalorder %v1888_v47, %v1882_v41 }
  0xfe   :  { %v224_v32 = vpop.permute.xlu1 %223 }
  0xff   :  { %vm254_vm13 = vcmp.eq.s32.totalorder %v1888_v47, %v224_v32 }
 0x100   :  { %vm270_vm15 = vmor %vm190_vm0, %vm254_vm13  ;;  %vm176_vm0 = vcmp.eq.s32.totalorder %v1888_v47, %v150_v40 }
 0x101   :  { %vm350_vm1 = vmor %vm270_vm15, %vm334_vm12 }
 0x102   :  { %vm367_vm2 = vmor %vm350_vm1, %vm358_vm8  ;;  %v227_v34 = vpop.permute.xlu1 %226 }
 0x103   :  { %v1360_v35 = vsel %vm367_vm2, 1.0, %v1700_v60  ;;  %vm255_vm5 = vcmp.eq.s32.totalorder %v1888_v47, %v227_v34 }
 0x104   :  { %1509 = vmatprep.mubr.msk.f32.mxu0 %vm413_vm7, %v1360_v35  ;;  %vm271_vm6 = vmor %vm191_vm14, %vm255_vm5  ;;  %vm256_vm5 = vcmp.eq.s32.totalorder %v1888_v47, %v1896_v50 }
 0x107   :  { %v307_v36 = vpop.permute.xlu1 %306 }
 0x108   :  { %vm335_vm10 = vcmp.eq.s32.totalorder %v1888_v47, %v307_v36 }
 0x109   :  { %vm351_vm11 = vmor %vm271_vm6, %vm335_vm10 }
 0x10a   :  { %vm368_vm9 = vmor %vm351_vm11, %vm358_vm8  ;;  %vm665_vm11 = vcmask 1040384  }
 0x10b   :  { %v1361_v37 = vsel %vm368_vm9, 1.0, %v1700_v60  ;;  %1537 = vmatprep.subr.msk.mxu1 %vm665_vm11, %v615_v45 }
 0x10c   :  { %v86_v38 = vpop.permute.xlu1 %85  ;;  %1510 = vmatmul.mubr.msk.f32.gmra.mrb[8].mxu0 %vm413_vm7, %v1361_v37  ;;  %1538 = vmatpush3.msk.msra.mxu1 %vm665_vm11, %v615_v45 }
 0x10d   :  { %vm112_vm12 = vcmp.eq.s32.totalorder %v1888_v47, %v86_v38  ;;  %1625 = vmatprep.subr.bf16.mxu1 %v1621_v19 }
 0x10e   :  { %vm192_vm15 = vmor %vm112_vm12, %vm176_vm0 }
 0x10f   :  { %vm272_vm10 = vmor %vm192_vm15, %vm256_vm5 }
 0x110   :  { %v89_v39 = vpop.permute.xlu1 %88 }
 0x111   :  { %vm113_vm1 = vcmp.eq.s32.totalorder %v1888_v47, %v89_v39 }
 0x115   :  { %v153_v42 = vpop.permute.xlu1 %152 }
 0x116   :  { %vm177_vm13 = vcmp.eq.s32.totalorder %v1888_v47, %v153_v42 }
 0x117   :  { %vm193_vm2 = vmor %vm113_vm1, %vm177_vm13 }
 0x11a   :  { %v233_v43 = vpop.permute.xlu1 %232 }
 0x11b   :  { %vm257_vm3 = vcmp.eq.s32.totalorder %v1888_v47, %v233_v43 }
 0x11c   :  { %vm273_vm14 = vmor %vm193_vm2, %vm257_vm3 }
 0x11d   :  { %vm353_vm6 = vmor %vm273_vm14, %vm337_vm4  ;;  %vm115_vm4 = vcmp.eq.s32.totalorder %v1888_v47, %v2023_v29 }
 0x11e   :  { %vm370_vm9 = vmor %vm353_vm6, %vm358_vm8 }
 0x11f   :  { %v310_v44 = vpop.permute.xlu1 %309  ;;  %v1363_v48 = vsel %vm370_vm9, 1.0, %v1700_v60 }
 0x120   :  { %vm336_vm12 = vcmp.eq.s32.totalorder %v1888_v47, %v310_v44 }
 0x121   :  { %vm352_vm0 = vmor %vm272_vm10, %vm336_vm12  ;;  %vm259_vm12 = vcmp.eq.s32.totalorder %v1888_v47, %v1902_v52  ;;  %v322_v52 = vpop.permute.xlu0 %321 }
 0x122   :  { %vm369_vm13 = vmor %vm352_vm0, %vm358_vm8 }
 0x123   :  { %v1362_v41 = vsel %vm369_vm13, 1.0, %v1700_v60 }
 0x124   :  { %v92_v46 = vpop.permute.xlu1 %91  ;;  %1512 = vmatprep.mubr.msk.f32.mxu0 %vm413_vm7, %v1362_v41 }
 0x125   :  { %1513 = vmatmul.mubr.msk.f32.gmra.mrb[10].mxu0 %vm413_vm7, %v1363_v48  ;;  %vm114_vm2 = vcmp.eq.s32.totalorder %v1888_v47, %v92_v46 }
 0x129   :  { %v156_v49 = vpop.permute.xlu1 %155 }
 0x12a   :  { %vm178_vm15 = vcmp.eq.s32.totalorder %v1888_v47, %v156_v49 }
 0x12b   :  { %vm194_vm5 = vmor %vm114_vm2, %vm178_vm15 }
 0x12d   :  { %v159_v50 = vpop.permute.xlu1 %158 }
 0x12e   :  { %vm179_vm1 = vcmp.eq.s32.totalorder %v1888_v47, %v159_v50 }
 0x12f   :  { %vm195_vm14 = vmor %vm115_vm4, %vm179_vm1  ;;  %vm340_vm4 = vcmp.eq.s32.totalorder %v1888_v47, %v322_v52 }
 0x130   :  { %vm275_vm0 = vmor %vm195_vm14, %vm259_vm12 }
 0x132   :  { %v236_v51 = vpop.permute.xlu1 %235 }
 0x133   :  { %vm258_vm3 = vcmp.eq.s32.totalorder %v1888_v47, %v236_v51 }
 0x134   :  { %vm274_vm6 = vmor %vm194_vm5, %vm258_vm3  ;;  %vm116_vm3 = vcmp.eq.s32.totalorder %v1888_v47, %v2025_v31 }
 0x137   :  { %v316_v53 = vpop.permute.xlu1 %315 }
 0x138   :  { %vm338_vm10 = vcmp.eq.s32.totalorder %v1888_v47, %v316_v53 }
 0x139   :  { %vm354_vm11 = vmor %vm274_vm6, %vm338_vm10 }
 0x13a   :  { %vm371_vm9 = vmor %vm354_vm11, %vm358_vm8 }
 0x13b   :  { %v319_v54 = vpop.permute.xlu1 %318  ;;  %v1364_v55 = vsel %vm371_vm9, 1.0, %v1700_v60  ;;  %vm181_vm9 = vcmp.eq.s32.totalorder %v1888_v47, %v165_v58 }
 0x13c   :  { %vm339_vm13 = vcmp.eq.s32.totalorder %v1888_v47, %v319_v54  ;;  %1515 = vmatprep.mubr.msk.f32.mxu0 %vm413_vm7, %v1364_v55 }
 0x13d   :  { %vm355_vm15 = vmor %vm275_vm0, %vm339_vm13 }
 0x13e   :  { %vm372_vm1 = vmor %vm355_vm15, %vm358_vm8 }
 0x13f   :  { %v1365_v56 = vsel %vm372_vm1, 1.0, %v1700_v60 }
 0x140   :  { %v162_v57 = vpop.permute.xlu1 %161  ;;  %1516 = vmatmul.mubr.msk.f32.gmra.mrb[12].mxu0 %vm413_vm7, %v1365_v56 }
 0x141   :  { %vm180_vm2 = vcmp.eq.s32.totalorder %v1888_v47, %v162_v57 }
 0x142   :  { %vm196_vm5 = vmor %vm116_vm3, %vm180_vm2 }
 0x145   :  { %v101_v59 = vpop.permute.xlu1 %100 }
 0x146   :  { %vm117_vm12 = vcmp.eq.s32.totalorder %v1888_v47, %v101_v59 }
 0x147   :  { %vm197_vm13 = vmor %vm117_vm12, %vm181_vm9  ;;  %vm1080_vm9 = vcmp.eq.s32.totalorder %v1888_v47, 3 }
 0x14a   :  { %v242_v61 = vpop.permute.xlu1 %241 }
 0x14b   :  { %vm260_vm14 = vcmp.eq.s32.totalorder %v1888_v47, %v242_v61 }
 0x14c   :  { %vm276_vm6 = vmor %vm196_vm5, %vm260_vm14  ;;  %vm1113_vm5 = vcmp.eq.s32.totalorder %v1888_v47, 1  ;;  %vm1114_vm14 = vcmp.eq.s32.totalorder %v1888_v47, 6 }
 0x14d   :  { %vm356_vm10 = vmor %vm276_vm6, %vm340_vm4  ;;  %vm616_vm4 = vcmask 531456   ;;  %vm1181_vm6 = vcmp.eq.s32.totalorder %v1888_v47, 2 }
 0x14e   :  { %vm373_vm11 = vmor %vm356_vm10, %vm358_vm8  ;;  %v245_v62 = vpop.permute.xlu1 %244  ;;  %vm1182_vm10 = vcmp.eq.s32.totalorder %v1888_v47, 7 }
 0x14f   :  { %v1366_v63 = vsel %vm373_vm11, 1.0, %v1700_v60  ;;  %vm261_vm0 = vcmp.eq.s32.totalorder %v1888_v47, %v245_v62  ;;  %vm1047_vm11 = vcmp.eq.s32.totalorder %v1888_v47, 0  ;;  %vm2147_vm12 = vmor %vm1113_vm5, %vm1114_vm14 }
 0x150   :  { %1518 = vmatprep.mubr.msk.f32.mxu0 %vm413_vm7, %v1366_v63  ;;  %vm277_vm15 = vmor %vm197_vm13, %vm261_vm0  ;;  %vm1148_vm0 = vcmp.eq.s32.totalorder %v1888_v47, 4 }
 0x151   :  { %vm2152_vm13 = vmor %vm1181_vm6, %vm1182_vm10 }
 0x153   :  { %v325_v0 = vpop.permute.xlu1 %324 }
 0x154   :  { %vm341_vm1 = vcmp.eq.s32.totalorder %v1888_v47, %v325_v0 }
 0x155   :  { %vm357_vm2 = vmor %vm277_vm15, %vm341_vm1  ;;  %vm1216_vm15 = vcmp.eq.s32.totalorder %v1888_v47, 5  ;;  %vm1249_vm1 = vcmp.eq.s32.totalorder %v1888_v47, 8  ;;  %v1285_v47 = vld [vmem:[%s2688_s4 + $0x18] sm:$0xff] }
 0x156   :  { %vm374_vm3 = vmor %vm357_vm2, %vm358_vm8  ;;  %vm898_vm8 = vcmask 1043456   ;;  %vm1329_vm2 = vcmask 72704  }
 0x157   :  { %v1367_v1 = vsel %vm374_vm3, 1.0, %v1700_v60  ;;  %1567 = vmatprep.subr.msk.mxu0 %vm898_vm8, %v848_v28  ;;  %vm1345_vm3 = vcmask 7168  }
 0x158   :  { %1519 = vmatmul.mubr.msk.f32.gmra.mrb[14].mxu0 %vm413_vm7, %v1367_v1  ;;  %vm849_vm7 = vcmask 162816  }
 0x159   :  { %1568 = vmatpush3.msk.msra.mxu0 %vm898_vm8, %v848_v28 }
 0x19e   :  { %v1499_v2 = vpop.f32.mrb[0].mxu0 }
 0x19f   :  { %v528_v3 = vpop.f32.mrb[1].mxu0 }
 0x1a0   :  { %1539 = vmatprep.mubr.msk.f32.mxu1 %vm616_vm4, %v528_v3 }
 0x1a1   :  { %1540 = vmatmul.mubr.msk.f32.vlgmr.msra.gmra.mrb[0].mxu1 %vm616_vm4, %v1499_v2 }
 0x1a2   :  { %1627 = vmatpush3.bf16.msra.mxu1 %v1621_v19 }
 0x1a3   :  { %v1502_v4 = vpop.f32.mrb[2].mxu0  ;;  %1626 = vmatprep.subr.msk.mxu1 %vm898_vm8, %v848_v28 }
 0x1a4   :  { %v538_v5 = vpop.f32.mrb[3].mxu0 }
 0x1a5   :  { %1542 = vmatprep.mubr.msk.f32.mxu1 %vm616_vm4, %v538_v5 }
 0x1a6   :  { %1543 = vmatmul.mubr.msk.f32.gmra.mrb[2].mxu1 %vm616_vm4, %v1502_v4 }
 0x1a7   :  { %1628 = vmatpush3.msk.msra.mxu1 %vm898_vm8, %v848_v28 }
 0x1ac   :  { %v1505_v6 = vpop.f32.mrb[4].mxu0 }
 0x1ad   :  { %v548_v7 = vpop.f32.mrb[5].mxu0 }
 0x1ae   :  { %1545 = vmatprep.mubr.msk.f32.mxu1 %vm616_vm4, %v548_v7 }
 0x1af   :  { %1546 = vmatmul.mubr.msk.f32.gmra.mrb[4].mxu1 %vm616_vm4, %v1505_v6 }
 0x1c7   :  { %v1508_v60 = vpop.f32.mrb[6].mxu0 }
 0x1c8   :  { %v558_v8 = vpop.f32.mrb[7].mxu0 }
 0x1c9   :  { %1548 = vmatprep.mubr.msk.f32.mxu1 %vm616_vm4, %v558_v8 }
 0x1ca   :  { %1549 = vmatmul.mubr.msk.f32.gmra.mrb[6].mxu1 %vm616_vm4, %v1508_v60 }
 0x1df   :  { %v1511_v9 = vpop.f32.mrb[8].mxu0 }
 0x1e0   :  { %v568_v10 = vpop.f32.mrb[9].mxu0 }
 0x1e1   :  { %1551 = vmatprep.mubr.msk.f32.mxu1 %vm616_vm4, %v568_v10 }
 0x1e2   :  { %1552 = vmatmul.mubr.msk.f32.gmra.mrb[8].mxu1 %vm616_vm4, %v1511_v9 }
 0x1f8   :  { %v1514_v11 = vpop.f32.mrb[10].mxu0 }
 0x1f9   :  { %v578_v12 = vpop.f32.mrb[11].mxu0 }
 0x1fa   :  { %1554 = vmatprep.mubr.msk.f32.mxu1 %vm616_vm4, %v578_v12 }
 0x1fb   :  { %1555 = vmatmul.mubr.msk.f32.gmra.mrb[10].mxu1 %vm616_vm4, %v1514_v11 }
 0x213   :  { %v1517_v13 = vpop.f32.mrb[12].mxu0 }
 0x214   :  { %v588_v14 = vpop.f32.mrb[13].mxu0 }
 0x215   :  { %1557 = vmatprep.mubr.msk.f32.mxu1 %vm616_vm4, %v588_v14 }
 0x216   :  { %1558 = vmatmul.mubr.msk.f32.gmra.mrb[12].mxu1 %vm616_vm4, %v1517_v13 }
 0x22b   :  { %v1520_v15 = vpop.f32.mrb[14].mxu0 }
 0x22c   :  { %v598_v16 = vpop.f32.mrb[15].mxu0 }
 0x22d   :  { %1560 = vmatprep.mubr.msk.f32.mxu1 %vm616_vm4, %v598_v16 }
 0x22e   :  { %1561 = vmatmul.mubr.msk.f32.gmra.mrb[14].mxu1 %vm616_vm4, %v1520_v15 }
 0x274   :  { %v1541_v20 = vpop.f32.mrb[0].mxu1 }
 0x275   :  { %v735_v21 = vpop.f32.mrb[1].mxu1 }
 0x279   :  { %v1544_v22 = vpop.f32.mrb[2].mxu1 }
 0x27a   :  { %v815_v23 = vmax.f32 %v1541_v20, %v1544_v22  ;;  %v745_v24 = vpop.f32.mrb[3].mxu1 }
 0x27b   :  { %v814_v25 = vmax.f32 %v735_v21, %v745_v24 }
 0x282   :  { %v1547_v26 = vpop.f32.mrb[4].mxu1 }
 0x283   :  { %v755_v27 = vpop.f32.mrb[5].mxu1 }
 0x29d   :  { %v1550_v29 = vpop.f32.mrb[6].mxu1 }
 0x29e   :  { %v817_v30 = vmax.f32 %v1547_v26, %v1550_v29  ;;  %v765_v31 = vpop.f32.mrb[7].mxu1 }
 0x29f   :  { %v816_v32 = vmax.f32 %v755_v27, %v765_v31 }
 0x2a0   :  { %v819_v33 = vmax.f32 %v815_v23, %v817_v30 }
 0x2a1   :  { %v818_v34 = vmax.f32 %v814_v25, %v816_v32 }
 0x2b5   :  { %v1553_v35 = vpop.f32.mrb[8].mxu1 }
 0x2b6   :  { %v775_v36 = vpop.f32.mrb[9].mxu1 }
 0x2ce   :  { %v1556_v37 = vpop.f32.mrb[10].mxu1 }
 0x2cf   :  { %v821_v38 = vmax.f32 %v1553_v35, %v1556_v37  ;;  %v785_v39 = vpop.f32.mrb[11].mxu1 }
 0x2d0   :  { %v820_v40 = vmax.f32 %v775_v36, %v785_v39 }
 0x2e9   :  { %v1559_v42 = vpop.f32.mrb[12].mxu1 }
 0x2ea   :  { %v795_v43 = vpop.f32.mrb[13].mxu1 }
 0x301   :  { %v1562_v44 = vpop.f32.mrb[14].mxu1 }
 0x302   :  { %v823_v45 = vmax.f32 %v1559_v42, %v1562_v44  ;;  %v805_v41 = vpop.f32.mrb[15].mxu1 }
 0x303   :  { %v822_v46 = vmax.f32 %v795_v43, %v805_v41 }
 0x304   :  { %v825_v48 = vmax.f32 %v821_v38, %v823_v45 }
 0x305   :  { %v824_v49 = vmax.f32 %v820_v40, %v822_v46 }
 0x306   :  { %v827_v50 = vmax.f32 %v819_v33, %v825_v48 }
 0x307   :  { %v826_v51 = vmax.f32 %v818_v34, %v824_v49 }
 0x308   :  { %1673 = vrcp.f32 %v827_v50 }
 0x309   :  { %1675 = vrcp.f32 %v826_v51 }
 0x312   :  { %v1674_v53 = vpop.eup %1673 }
 0x313   :  { %v1676_v54 = vpop.eup %1675  ;;  %v845_v55 = vmul.f32 %v1674_v53, %v1562_v44  ;;  %v831_v56 = vmul.f32 %v1674_v53, %v1541_v20  ;;  %v841_v57 = vmul.f32 %v1674_v53, %v1556_v37  ;;  %v833_v58 = vmul.f32 %v1674_v53, %v1544_v22 }
 0x314   :  { %v844_v59 = vmul.f32 %v1676_v54, %v805_v41  ;;  %v830_v52 = vmul.f32 %v1676_v54, %v735_v21  ;;  %v840_v61 = vmul.f32 %v1676_v54, %v785_v39  ;;  %v832_v62 = vmul.f32 %v1676_v54, %v745_v24 }
 0x315   :  { %v842_v63 = vmul.f32 %v1676_v54, %v795_v43  ;;  %v843_v0 = vmul.f32 %v1674_v53, %v1559_v42  ;;  %v834_v1 = vmul.f32 %v1676_v54, %v755_v27  ;;  %v835_v2 = vmul.f32 %v1674_v53, %v1547_v26 }
 0x316   :  { %1569 = vmatprep.mubr.msk.f32.mxu0 %vm849_vm7, %v830_v52  ;;  %1584 = vmatprep.mubr.msk.f32.mxu1 %vm849_vm7, %v840_v61  ;;  %v836_v3 = vmul.f32 %v1676_v54, %v765_v31  ;;  %v837_v4 = vmul.f32 %v1674_v53, %v1550_v29  ;;  %v838_v5 = vmul.f32 %v1676_v54, %v775_v36 }
 0x317   :  { %1570 = vmatmul.mubr.msk.f32.vlgmr.msra.gmra.mrb[16].mxu0 %vm849_vm7, %v831_v56  ;;  %1585 = vmatmul.mubr.msk.f32.vlgmr.msra.gmra.mrb[16].mxu1 %vm849_vm7, %v841_v57  ;;  %v839_v6 = vmul.f32 %v1674_v53, %v1553_v35 }
 0x318   :  { %1572 = vmatprep.mubr.msk.f32.mxu0 %vm849_vm7, %v832_v62  ;;  %1587 = vmatprep.mubr.msk.f32.mxu1 %vm849_vm7, %v842_v63 }
 0x31b   :  { %1573 = vmatmul.mubr.msk.f32.gmra.mrb[18].mxu0 %vm849_vm7, %v833_v58  ;;  %1588 = vmatmul.mubr.msk.f32.gmra.mrb[18].mxu1 %vm849_vm7, %v843_v0 }
 0x31c   :  { %1575 = vmatprep.mubr.msk.f32.mxu0 %vm849_vm7, %v834_v1  ;;  %1590 = vmatprep.mubr.msk.f32.mxu1 %vm849_vm7, %v844_v59 }
 0x31f   :  { %1576 = vmatmul.mubr.msk.f32.gmra.mrb[20].mxu0 %vm849_vm7, %v835_v2  ;;  %1591 = vmatmul.mubr.msk.f32.gmra.mrb[20].mxu1 %vm849_vm7, %v845_v55 }
 0x320   :  { %1578 = vmatprep.mubr.msk.f32.mxu0 %vm849_vm7, %v836_v3 }
 0x323   :  { %1579 = vmatmul.mubr.msk.f32.gmra.mrb[22].mxu0 %vm849_vm7, %v837_v4 }
 0x324   :  { %1581 = vmatprep.mubr.msk.f32.mxu0 %vm849_vm7, %v838_v5 }
 0x327   :  { %1582 = vmatmul.mubr.msk.f32.gmra.mrb[24].mxu0 %vm849_vm7, %v839_v6 }
 0x3ea   :  { %v2156_v8 = vpop.f32.mrb[16].mxu0  ;;  %v2158_v9 = vpop.f32.mrb[16].mxu1 }
 0x3eb   :  { %v1052_v10 = vsel %vm1047_vm11, %v2156_v8, 0.0  ;;  %v1084_v11 = vsel %vm1080_vm9, %v2156_v8, 0.0  ;;  %v1118_v12 = vsel %vm2147_vm12, %v2156_v8, 0.0  ;;  %v2172_v13 = vsel %vm1148_vm0, %v2156_v8, 0.0  ;;  %v2174_v14 = vpop.f32.mrb[17].mxu0  ;;  %v2176_v15 = vpop.f32.mrb[17].mxu1 }
 0x3ec   :  { %v1062_v17 = vsel %vm1047_vm11, %v2158_v9, 0.0  ;;  %v1094_v18 = vsel %vm1080_vm9, %v2158_v9, 0.0  ;;  %v1128_v19 = vsel %vm2147_vm12, %v2158_v9, 0.0  ;;  %v2193_v20 = vsel %vm1148_vm0, %v2158_v9, 0.0 }
 0x3ed   :  { %v1051_v22 = vsel %vm1047_vm11, %v2174_v14, 0.0  ;;  %v1083_v23 = vsel %vm1080_vm9, %v2174_v14, 0.0  ;;  %v1117_v25 = vsel %vm2147_vm12, %v2174_v14, 0.0  ;;  %v2210_v26 = vsel %vm1148_vm0, %v2174_v14, 0.0 }
 0x3ee   :  { %v1100_v24 = vadd.f32 %v1084_v11, %v1051_v22  ;;  %v2215_v28 = vpop.f32.mrb[18].mxu0  ;;  %v2217_v29 = vpop.f32.mrb[18].mxu1  ;;  %v1061_v30 = vsel %vm1047_vm11, %v2176_v15, 0.0  ;;  %v2225_v31 = vsel %vm1080_vm9, %v2176_v15, 0.0  ;;  %v1127_v32 = vsel %vm2147_vm12, %v2176_v15, 0.0 }
 0x3ef   :  { %v2233_v33 = vsel %vm1148_vm0, %v2176_v15, 0.0  ;;  %v2235_v34 = vpop.f32.mrb[19].mxu0  ;;  %v2237_v35 = vpop.f32.mrb[19].mxu1  ;;  %v1110_v36 = vadd.f32 %v1094_v18, %v1061_v30  ;;  %v1054_v38 = vsel %vm1047_vm11, %v2215_v28, 0.0  ;;  %v1086_v39 = vsel %vm1080_vm9, %v2215_v28, 0.0 }
 0x3f0   :  { %v1120_v40 = vsel %vm2147_vm12, %v2215_v28, 0.0  ;;  %v2254_v42 = vsel %vm1148_vm0, %v2215_v28, 0.0  ;;  %v1096_v44 = vsel %vm1080_vm9, %v2217_v29, 0.0  ;;  %v1130_v45 = vsel %vm2147_vm12, %v2217_v29, 0.0 }
 0x3f1   :  { %v1162_v41 = vsel %vm1148_vm0, %v2217_v29, 0.0  ;;  %v1053_v48 = vsel %vm1047_vm11, %v2235_v34, 0.0  ;;  %v1085_v51 = vsel %vm1080_vm9, %v2235_v34, 0.0  ;;  %v1119_v54 = vsel %vm2147_vm12, %v2235_v34, 0.0 }
 0x3f2   :  { %v2274_v49 = vpop.f32.mrb[20].mxu0  ;;  %v2276_v50 = vpop.f32.mrb[20].mxu1  ;;  %v1102_v53 = vadd.f32 %v1086_v39, %v1053_v48  ;;  %v2287_v55 = vsel %vm1148_vm0, %v2235_v34, 0.0  ;;  %v1101_v58 = vadd.f32 %v1085_v51, %v1052_v10  ;;  %v2291_v59 = vadd.f32 %v1119_v54, %v1100_v24 }
 0x3f3   :  { %v2289_v56 = vpop.f32.mrb[21].mxu0  ;;  %v1038_v57 = vpop.f32.mrb[21].mxu1  ;;  %v1063_v61 = vsel %vm1047_vm11, %v2237_v35, 0.0  ;;  %v1095_v62 = vsel %vm1080_vm9, %v2237_v35, 0.0  ;;  %v1129_v63 = vsel %vm2147_vm12, %v2237_v35, 0.0  ;;  %v2308_v0 = vsel %vm1148_vm0, %v2237_v35, 0.0 }
 0x3f4   :  { %v1111_v2 = vadd.f32 %v1095_v62, %v1062_v17  ;;  %v1145_v3 = vadd.f32 %v1129_v63, %v1110_v36  ;;  %v1056_v4 = vsel %vm1047_vm11, %v2274_v49, 0.0  ;;  %v1088_v5 = vsel %vm1080_vm9, %v2274_v49, 0.0 }
 0x3f5   :  { %v1122_v10 = vsel %vm2147_vm12, %v2274_v49, 0.0  ;;  %v2328_v11 = vsel %vm1148_vm0, %v2274_v49, 0.0  ;;  %v1050_v18 = vsel %vm1047_vm11, %v2276_v50, 0.0  ;;  %v1116_v30 = vsel %vm2147_vm12, %v2276_v50, 0.0 }
 0x3f6   :  { %v2320_v6 = vpop.f32.mrb[22].mxu0  ;;  %v1099_v24 = vadd.f32 %v1083_v23, %v1050_v18  ;;  %v1164_v36 = vsel %vm1148_vm0, %v2276_v50, 0.0  ;;  %v1198_v39 = vsel %vm2152_vm13, %v2276_v50, 0.0  ;;  %v1055_v48 = vsel %vm1047_vm11, %v2289_v56, 0.0 }
 0x3f7   :  { %v2337_v22 = vpop.f32.mrb[23].mxu0  ;;  %v1087_v23 = vsel %vm1080_vm9, %v2289_v56, 0.0  ;;  %v1121_v51 = vsel %vm2147_vm12, %v2289_v56, 0.0  ;;  %v1136_v54 = vadd.f32 %v1120_v40, %v1101_v58  ;;  %v1104_v18 = vadd.f32 %v1088_v5, %v1055_v48 }
 0x3f8   :  { %v2361_v62 = vadd.f32 %v1118_v12, %v1099_v24  ;;  %v1103_v63 = vadd.f32 %v1087_v23, %v1054_v38  ;;  %v2363_v27 = vadd.f32 %v1121_v51, %v1102_v53  ;;  %v1153_v1 = vsel %vm1148_vm0, %v2289_v56, 0.0 }
 0x3f9   :  { %v1048_v58 = vsel %vm1047_vm11, %v2217_v29, 0.0  ;;  %v1049_v12 = vsel %vm1047_vm11, %v1038_v57, 0.0  ;;  %v2380_v53 = vadd.f32 %v1153_v1, %v1136_v54  ;;  %v1081_v5 = vsel %vm1080_vm9, %v1038_v57, 0.0 }
 0x3fa   :  { %v2365_v46 = vpop.f32.mrb[24].mxu0  ;;  %v1082_v24 = vsel %vm1080_vm9, %v2276_v50, 0.0  ;;  %v1112_v48 = vadd.f32 %v1096_v44, %v1063_v61  ;;  %v1097_v23 = vadd.f32 %v1081_v5, %v1048_v58  ;;  %v1131_v21 = vsel %vm2147_vm12, %v1038_v57, 0.0 }
 0x3fb   :  { %v2378_v38 = vpop.f32.mrb[25].mxu0  ;;  %v1098_v51 = vadd.f32 %v1082_v24, %v1049_v12  ;;  %v1146_v37 = vadd.f32 %v1130_v45, %v1111_v2  ;;  %v1163_v40 = vsel %vm1148_vm0, %v1038_v57, 0.0  ;;  %v1178_v1 = vadd.f32 %v1162_v41, %v1145_v3 }
 0x3fc   :  { %v1147_v17 = vadd.f32 %v1131_v21, %v1112_v48  ;;  %v1197_v54 = vsel %vm2152_vm13, %v1038_v57, 0.0  ;;  %v1132_v43 = vadd.f32 %v1116_v30, %v1097_v23  ;;  %v2399_v58 = vsel %vm1216_vm15, %v1038_v57, 0.0 }
 0x3fd   :  { %v1133_v44 = vadd.f32 %v1117_v25, %v1098_v51  ;;  %v1179_v61 = vadd.f32 %v1163_v40, %v1146_v37  ;;  %v2403_v21 = vadd.f32 %v1197_v54, %v1178_v1  ;;  %v2407_v41 = vsel %vm1249_vm1, %v1038_v57, 0.0 }
 0x3fe   :  { %v2401_v45 = vadd.f32 %v1164_v36, %v1147_v17  ;;  %v1090_v2 = vsel %vm1080_vm9, %v2320_v6, 0.0  ;;  %v1165_v3 = vadd.f32 %v2210_v26, %v1132_v43  ;;  %v1124_v17 = vsel %vm2147_vm12, %v2320_v6, 0.0 }
 0x3ff   :  { %v1166_v25 = vadd.f32 %v2172_v13, %v1133_v44  ;;  %v2414_v37 = vadd.f32 %v1198_v39, %v1179_v61  ;;  %v1156_v30 = vsel %vm1148_vm0, %v2320_v6, 0.0  ;;  %v1190_v57 = vsel %vm2152_vm13, %v2320_v6, 0.0 }
 0x400   :  { %v1057_v26 = vsel %vm1047_vm11, %v2337_v22, 0.0  ;;  %v1089_v13 = vsel %vm1080_vm9, %v2337_v22, 0.0  ;;  %v1123_v36 = vsel %vm2147_vm12, %v2337_v22, 0.0  ;;  %v1138_v39 = vadd.f32 %v1122_v10, %v1103_v63 }
 0x401   :  { %v1105_v43 = vadd.f32 %v1089_v13, %v1056_v4  ;;  %v1155_v40 = vsel %vm1148_vm0, %v2337_v22, 0.0  ;;  %v1139_v12 = vadd.f32 %v1123_v36, %v1104_v18  ;;  %v1189_v5 = vsel %vm2152_vm13, %v2337_v22, 0.0 }
 0x402   :  { %v1060_v24 = vsel %vm1047_vm11, %v2365_v46, 0.0  ;;  %v1126_v4 = vsel %vm2147_vm12, %v2365_v46, 0.0  ;;  %v1171_v48 = vadd.f32 %v1155_v40, %v1138_v39  ;;  %v1158_v63 = vsel %vm1148_vm0, %v2365_v46, 0.0 }
 0x403   :  { %v1109_v10 = vadd.f32 %v2225_v31, %v1060_v24  ;;  %v1192_v18 = vsel %vm2152_vm13, %v2365_v46, 0.0  ;;  %v1058_v23 = vsel %vm1047_vm11, %v2320_v6, 0.0  ;;  %v1059_v51 = vsel %vm1047_vm11, %v2378_v38, 0.0 }
 0x404   :  { %v1091_v31 = vsel %vm1080_vm9, %v2378_v38, 0.0  ;;  %v1092_v1 = vsel %vm1080_vm9, %v2365_v46, 0.0  ;;  %v1106_v44 = vadd.f32 %v1090_v2, %v1057_v26  ;;  %v1125_v36 = vsel %vm2147_vm12, %v2378_v38, 0.0 }
 0x405   :  { %v1144_v54 = vadd.f32 %v1128_v19, %v1109_v10  ;;  %v1107_v61 = vadd.f32 %v1091_v31, %v1058_v23  ;;  %v1108_v13 = vadd.f32 %v1092_v1, %v1059_v51  ;;  %v1140_v39 = vadd.f32 %v1124_v17, %v1105_v43 }
 0x406   :  { %v1157_v40 = vsel %vm1148_vm0, %v2378_v38, 0.0  ;;  %v1172_v24 = vadd.f32 %v1156_v30, %v1139_v12  ;;  %v1141_v52 = vadd.f32 %v1125_v36, %v1106_v44  ;;  %v1191_v2 = vsel %vm2152_vm13, %v2378_v38, 0.0 }
 0x407   :  { %v1142_v16 = vadd.f32 %v1126_v4, %v1107_v61  ;;  %v1143_v19 = vadd.f32 %v1127_v32, %v1108_v13  ;;  %v1173_v26 = vadd.f32 %v1157_v40, %v1140_v39  ;;  %v1206_v10 = vadd.f32 %v1190_v57, %v1171_v48 }
 0x408   :  { %v1207_v23 = vadd.f32 %v1191_v2, %v1172_v24  ;;  %v1223_v17 = vsel %vm1216_vm15, %v2378_v38, 0.0  ;;  %v1174_v43 = vadd.f32 %v1158_v63, %v1141_v52  ;;  %v2490_v7 = vsel %vm1249_vm1, %v2378_v38, 0.0 }
 0x409   :  { %v1175_v30 = vadd.f32 %v2233_v33, %v1142_v16  ;;  %v1176_v12 = vadd.f32 %v2193_v20, %v1143_v19  ;;  %v1208_v32 = vadd.f32 %v1192_v18, %v1173_v26  ;;  %v2492_v4 = vadd.f32 %v1223_v17, %v1206_v10 }
 0x40a   :  { %v1167_v57 = vadd.f32 %v2287_v55, %v2361_v62  ;;  %v1168_v48 = vadd.f32 %v2254_v42, %v2291_v59  ;;  %v1170_v52 = vadd.f32 %v2328_v11, %v2363_v27  ;;  %v1177_v16 = vadd.f32 %v2308_v0, %v1144_v54 }
 0x40b   :  { %v2701_v20 = vsel %vm2152_vm13, %v2156_v8, 0.0  ;;  %v2702_v38 = vsel %vm2152_vm13, %v2235_v34, 0.0  ;;  %v2703_v55 = vsel %vm2152_vm13, %v2215_v28, 0.0  ;;  %v2704_v27 = vsel %vm2152_vm13, %v2289_v56, 0.0 }
 0x40c   :  { %v1200_v33 = vadd.f32 %v2701_v20, %v1165_v3  ;;  %v1201_v63 = vadd.f32 %v2702_v38, %v1166_v25  ;;  %v1202_v42 = vadd.f32 %v2703_v55, %v1167_v57  ;;  %v1203_v59 = vadd.f32 %v2704_v27, %v1168_v48 }
 0x40d   :  { %v2705_v0 = vsel %vm2152_vm13, %v2274_v49, 0.0  ;;  %v2706_v62 = vsel %vm2152_vm13, %v2176_v15, 0.0  ;;  %v1205_v25 = vadd.f32 %v1189_v5, %v1170_v52  ;;  %v2707_v18 = vsel %vm2152_vm13, %v2158_v9, 0.0 }
 0x40e   :  { %v1204_v11 = vadd.f32 %v2705_v0, %v2380_v53  ;;  %v1209_v3 = vadd.f32 %v2706_v62, %v1174_v43  ;;  %v1210_v51 = vadd.f32 %v2707_v18, %v1175_v30  ;;  %v2708_v31 = vsel %vm2152_vm13, %v2237_v35, 0.0 }
 0x40f   :  { %v1211_v1 = vadd.f32 %v2708_v31, %v1176_v12  ;;  %v2709_v53 = vsel %vm2152_vm13, %v2217_v29, 0.0  ;;  %v2710_v5 = vsel %vm2152_vm13, %v2174_v14, 0.0  ;;  %v1217_v61 = vsel %vm1216_vm15, %v2235_v34, 0.0 }
 0x410   :  { %v1212_v54 = vadd.f32 %v2709_v53, %v1177_v16  ;;  %v1215_v44 = vadd.f32 %v2710_v5, %v2401_v45  ;;  %v1218_v13 = vsel %vm1216_vm15, %v2215_v28, 0.0  ;;  %v1219_v36 = vsel %vm1216_vm15, %v2289_v56, 0.0 }
 0x411   :  { %v1220_v39 = vsel %vm1216_vm15, %v2274_v49, 0.0  ;;  %v1221_v60 = vsel %vm1216_vm15, %v2337_v22, 0.0  ;;  %v1222_v45 = vsel %vm1216_vm15, %v2320_v6, 0.0  ;;  %v1224_v40 = vsel %vm1216_vm15, %v2365_v46, 0.0 }
 0x412   :  { %v1225_v24 = vsel %vm1216_vm15, %v2176_v15, 0.0  ;;  %v1226_v19 = vsel %vm1216_vm15, %v2158_v9, 0.0  ;;  %v1227_v2 = vsel %vm1216_vm15, %v2237_v35, 0.0  ;;  %v1228_v26 = vsel %vm1216_vm15, %v2217_v29, 0.0 }
 0x413   :  { %v1230_v10 = vsel %vm1216_vm15, %v2276_v50, 0.0  ;;  %v1231_v17 = vsel %vm1216_vm15, %v2174_v14, 0.0  ;;  %v1232_v43 = vsel %vm1216_vm15, %v2156_v8, 0.0  ;;  %v1233_v30 = vadd.f32 %v1217_v61, %v1200_v33  ;;  %v1290_v61 = vld [vmem:[%s2688_s4 + $0x40] sm:$0xff] }
 0x414   :  { %v1234_v12 = vadd.f32 %v1218_v13, %v1201_v63  ;;  %v1235_v57 = vadd.f32 %v1219_v36, %v1202_v42  ;;  %v1236_v48 = vadd.f32 %v1220_v39, %v1203_v59  ;;  %v1237_v52 = vadd.f32 %v1221_v60, %v1204_v11  ;;  %v1291_v13 = vld [vmem:[%s2688_s4 + $0x48] sm:$0xff] }
 0x415   :  { %v1238_v16 = vadd.f32 %v1222_v45, %v1205_v25  ;;  %v1240_v20 = vadd.f32 %v1224_v40, %v1207_v23  ;;  %v1241_v38 = vadd.f32 %v1225_v24, %v1208_v32  ;;  %v1242_v55 = vadd.f32 %v1226_v19, %v1209_v3  ;;  %v1286_v25 = vld [vmem:[%s2688_s4 + $0x20] sm:$0xff]  ;;  %v1293_v40 = vld [vmem:[%s2688_s4 + $0x58] sm:$0xff]  ;;  %v1295_v19 = vld [vmem:[%s2688_s4 + $0x68] sm:$0xff] }
 0x416   :  { %v1243_v27 = vadd.f32 %v1227_v2, %v1210_v51  ;;  %v1244_v0 = vadd.f32 %v1228_v26, %v1211_v1  ;;  %v1245_v62 = vadd.f32 %v2399_v58, %v1212_v54  ;;  %v1246_v18 = vadd.f32 %v1230_v10, %v2403_v21  ;;  %v1287_v51 = vld [vmem:[%s2688_s4 + $0x28] sm:$0xff]  ;;  %v1288_v1 = vld [vmem:[%s2688_s4 + $0x30] sm:$0xff]  ;;  %v1294_v24 = vld [vmem:[%s2688_s4 + $0x60] sm:$0xff] }
 0x417   :  { %v1247_v31 = vadd.f32 %v1231_v17, %v2414_v37  ;;  %v1248_v53 = vadd.f32 %v1232_v43, %v1215_v44  ;;  %v1250_v33 = vsel %vm1249_vm1, %v2215_v28, 0.0  ;;  %v1251_v63 = vsel %vm1249_vm1, %v2289_v56, 0.0  ;;  %v1296_v2 = vld [vmem:[%s2688_s4 + $0x70] sm:$0xff]  ;;  %v1297_v26 = vld [vmem:[%s2688_s4 + $0x78] sm:$0xff] }
 0x418   :  { %v1252_v23 = vsel %vm1249_vm1, %v2274_v49, 0.0  ;;  %v1253_v58 = vsel %vm1249_vm1, %v2337_v22, 0.0  ;;  %v1254_v21 = vsel %vm1249_vm1, %v2320_v6, 0.0  ;;  %v1256_v28 = vsel %vm1249_vm1, %v2365_v46, 0.0 }
 0x419   :  { %v1257_v56 = vsel %vm1249_vm1, %v2176_v15, 0.0  ;;  %v1258_v49 = vsel %vm1249_vm1, %v2158_v9, 0.0  ;;  %v1259_v22 = vsel %vm1249_vm1, %v2237_v35, 0.0  ;;  %v1260_v6 = vsel %vm1249_vm1, %v2217_v29, 0.0  ;;  %v1282_v29 = vld [vmem:[%s2688_s4] sm:$0xff] }
 0x41a   :  { %v1262_v46 = vsel %vm1249_vm1, %v2276_v50, 0.0  ;;  %v1263_v15 = vsel %vm1249_vm1, %v2174_v14, 0.0  ;;  %v1264_v9 = vsel %vm1249_vm1, %v2156_v8, 0.0  ;;  %v1265_v35 = vsel %vm1249_vm1, %v2235_v34, 0.0  ;;  %v1283_v14 = vld [vmem:[%s2688_s4 + $0x8] sm:$0xff]  ;;  %v1284_v8 = vld [vmem:[%s2688_s4 + $0x10] sm:$0xff] }
 0x41b   :  { %v1266_v37 = vadd.f32 %v1250_v33, %v1233_v30  ;;  %v1267_v32 = vadd.f32 %v1251_v63, %v1234_v12  ;;  %v1268_v42 = vadd.f32 %v1252_v23, %v1235_v57  ;;  %v1269_v50 = vadd.f32 %v1253_v58, %v1236_v48 }
 0x41c   :  { %v1270_v34 = vadd.f32 %v1254_v21, %v1237_v52  ;;  %v1271_v59 = vadd.f32 %v2490_v7, %v1238_v16  ;;  %v1272_v11 = vadd.f32 %v1256_v28, %v2492_v4  ;;  %v1273_v3 = vadd.f32 %v1257_v56, %v1240_v20  ;;  %v1289_v4 = vld [vmem:[%s2688_s4 + $0x38] sm:$0xff] }
 0x41d   :  { %v1274_v54 = vadd.f32 %v1258_v49, %v1241_v38  ;;  %v1275_v5 = vadd.f32 %v1259_v22, %v1242_v55  ;;  %v1276_v44 = vadd.f32 %v1260_v6, %v1243_v27  ;;  %v1277_v7 = vadd.f32 %v2407_v41, %v1244_v0  ;;  %v1292_v41 = vld [vmem:[%s2688_s4 + $0x50] sm:$0xff]  ;;  %s1333_s4 = sld [smem:[#allocation2]] }
 0x41e   :  { %v1278_v36 = vadd.f32 %v1262_v46, %v1245_v62  ;;  %v1279_v39 = vadd.f32 %v1263_v15, %v1246_v18  ;;  %v1280_v60 = vadd.f32 %v1264_v9, %v1247_v31  ;;  %v1281_v45 = vadd.f32 %v1265_v35, %v1248_v53 }
 0x41f   :  { %v1298_v10 = vmul.f32 %v1282_v29, %v1266_v37  ;;  %v1299_v17 = vmul.f32 %v1283_v14, %v1267_v32  ;;  %v1300_v43 = vmul.f32 %v1284_v8, %v1268_v42  ;;  %v1301_v30 = vmul.f32 %v1285_v47, %v1269_v50 }
 0x420   :  { %v1302_v12 = vmul.f32 %v1286_v25, %v1270_v34  ;;  %v1303_v57 = vmul.f32 %v1287_v51, %v1271_v59  ;;  %v1304_v48 = vmul.f32 %v1288_v1, %v1272_v11  ;;  %v1305_v52 = vmul.f32 %v1289_v4, %v1273_v3 }
 0x421   :  { %v1306_v16 = vmul.f32 %v1290_v61, %v1274_v54  ;;  %v1307_v20 = vmul.f32 %v1291_v13, %v1275_v5  ;;  %v1308_v38 = vmul.f32 %v1292_v41, %v1276_v44  ;;  %v1309_v55 = vmul.f32 %v1293_v40, %v1277_v7 }
 0x422   :  { %v1310_v27 = vmul.f32 %v1294_v24, %v1278_v36  ;;  %v1311_v0 = vmul.f32 %v1295_v19, %v1279_v39  ;;  %v1312_v62 = vmul.f32 %v1296_v2, %v1280_v60  ;;  %v1313_v18 = vmul.f32 %v1297_v26, %v1281_v45 }
 0x423   :  { %v1314_v31 = vadd.f32 %v1299_v17, %v1298_v10  ;;  %v1315_v53 = vadd.f32 %v1301_v30, %v1300_v43  ;;  %v1316_v33 = vadd.f32 %v1303_v57, %v1302_v12  ;;  %v1317_v63 = vadd.f32 %v1305_v52, %v1304_v48 }
 0x424   :  { %v1318_v23 = vadd.f32 %v1307_v20, %v1306_v16  ;;  %v1319_v58 = vadd.f32 %v1309_v55, %v1308_v38  ;;  %v1320_v21 = vadd.f32 %v1311_v0, %v1310_v27  ;;  %v1321_v28 = vadd.f32 %v1313_v18, %v1312_v62 }
 0x425   :  { %v1322_v56 = vadd.f32 %v1315_v53, %v1314_v31  ;;  %v1323_v49 = vadd.f32 %v1317_v63, %v1316_v33  ;;  %v1334_v29 = vstv %s1333_s4  ;;  %v1343_v47 = vstv %s1418_s17 }
 0x426   :  { %v1324_v22 = vadd.f32 %v1319_v58, %v1318_v23  ;;  %v1325_v6 = vadd.f32 %v1321_v28, %v1320_v21 }
 0x427   :  { %v1326_v46 = vadd.f32 %v1323_v49, %v1322_v56 }
 0x428   :  { %v1327_v15 = vadd.f32 %v1325_v6, %v1324_v22 }
 0x42a   :  { %v1328_v9 = vadd.f32 %v1327_v15, %v1326_v46 }
 0x42c   :  { %v1330_v35 = vsel %vm1329_vm2, %v1328_v9, 0.0 }
 0x42d   :  { %1331 = vadd.xlane.f32.xlu1 %v1330_v35 }
 0x4ba   :  { %v1332_v37 = vpop.xlane.xlu1 %1331 }
 0x4bb   :  { %v1335_v32 = vadd.f32 %v1334_v29, %v1332_v37 }
 0x4bd   :  { %v1336_v42 = vsub.f32 %v1335_v32, %v1335_v32 }
 0x4bf   :  { %v1337_v50 = vmul.f32 1.442695, %v1336_v42 }
 0x4c1   :  { %1677 = vpow2.f32 %v1337_v50 }
 0x4cb   :  { %v1678_v14 = vpop.eup %1677 }
 0x4cc   :  { %1679 = vrcp.f32 %v1678_v14 }
 0x4d6   :  { %v1680_v8 = vpop.eup %1679 }
 0x4d7   :  { %v1341_v34 = vmul.f32 %v1680_v8, %v1678_v14 }
 0x4d9   :  { %v1344_v59 = vmul.f32 %v1343_v47, %v1341_v34 }
 0x4db   :  { %1346 = vst.msk [vmem:[%s2690_s6] sm:$0xff] %vm1345_vm3, %v1344_v59 }
 0x4dc   :  { %1351 = vsyncpa [#allocation3], 1 }

</bundles_post_ra>
